<compile_context>
chip_gen: v7x
topology: tpu7x:2x2x1
jax: 0.10.0
libtpu: 0.0.40
codegen_flags: <defaults>
</compile_context>

<pallas_src>
import jax
import jax.numpy as jnp
from jax.experimental import pallas as pl
from jax.experimental.pallas import tpu as pltpu


def _round_up(x, m):
    return (x + m - 1) // m * m


def tnet_kernel(x_ref,
                w1_ref, b1_ref, w2_ref, b2_ref, w3_ref, b3_ref,
                wf1_ref, bf1_ref, wf2_ref, bf2_ref, wf3_ref, bf3_ref,
                out_ref, g_ref):
    """One grid step processes Bt batch elements x Nt points.

    x_ref  : (Bt, Nt, kp)  bf16  current tile of points (channels-last)
    g_ref  : (Bt, 1024)    f32   running max over the point axis (scratch)
    out_ref: (Bt, kk_pad)  f32   written on the last point tile
    """
    n = pl.program_id(1)
    bt, nt, kp = x_ref.shape

    @pl.when(n == 0)
    def _init():
        g_ref[...] = jnp.full_like(g_ref, -jnp.inf)

    # Pointwise convs (kernel_size=1 => matmul) with ReLU.
    # bf16 operands, f32 accumulation, f32 bias add.
    x = x_ref[...].reshape(bt * nt, kp)
    h = jnp.dot(x, w1_ref[...], preferred_element_type=jnp.float32) + b1_ref[...]
    h = jnp.maximum(h, 0.0).astype(jnp.bfloat16)
    h = jnp.dot(h, w2_ref[...], preferred_element_type=jnp.float32) + b2_ref[...]
    h = jnp.maximum(h, 0.0).astype(jnp.bfloat16)
    h = jnp.dot(h, w3_ref[...], preferred_element_type=jnp.float32) + b3_ref[...]
    h = jnp.maximum(h, 0.0)                                    # (bt*nt, 1024) f32

    # Running max over the point axis (torch.max(x, 2)[0]), per batch element.
    for i in range(bt):  # small static unroll over the batch tile
        hm = jnp.max(h[i * nt:(i + 1) * nt, :], axis=0, keepdims=True)  # (1,1024)
        g_ref[i:i + 1, :] = jnp.maximum(g_ref[i:i + 1, :], hm)

    # On the last point tile: fully-connected head, batched over Bt (M = Bt).
    @pl.when(n == pl.num_programs(1) - 1)
    def _finish():
        g = g_ref[...].astype(jnp.bfloat16)                    # (Bt, 1024)
        f = jnp.dot(g, wf1_ref[...], preferred_element_type=jnp.float32) + bf1_ref[...]
        f = jnp.maximum(f, 0.0).astype(jnp.bfloat16)
        f = jnp.dot(f, wf2_ref[...], preferred_element_type=jnp.float32) + bf2_ref[...]
        f = jnp.maximum(f, 0.0).astype(jnp.bfloat16)
        f = jnp.dot(f, wf3_ref[...], preferred_element_type=jnp.float32) + bf3_ref[...]
        # identity matrix already folded into bf3 in the wrapper
        out_ref[...] = f.astype(out_ref.dtype)                 # (Bt, kk_pad)


def tnet_forward(x_bkn, params, k, *, bt=8, nt=256,
                 vmem_limit_bytes=48 * 1024 * 1024):
    """x_bkn: (B, k, N) float32 (PyTorch NCW layout).  Returns (B, k, k) f32."""
    (w1, b1, w2, b2, w3, b3, wf1, bf1, wf2, bf2, wf3, bf3) = params
    B, k_in, N = x_bkn.shape
    assert k_in == k
    kk = k * k

    # --- static tiling / padding choices ------------------------------------
    kp = max(8, k)                      # pad tiny channel dim (MXU contraction)
    kk_pad = _round_up(kk, 128)         # lane-dense output block

    if B > bt:
        Bt = 8                          # multiple batch tiles: sublane aligned
        B_pad = _round_up(B, Bt)
    else:
        Bt, B_pad = B, B                # single batch tile covers the full dim

    Nt = min(nt, N)
    N_pad = _round_up(N, Nt)

    # --- input layout: (B, k, N) -> (B_pad, N_pad, kp) bf16 ------------------
    x = jnp.transpose(x_bkn, (0, 2, 1))                        # (B, N, k)
    if kp > k:
        x = jnp.pad(x, ((0, 0), (0, 0), (0, kp - k)))          # zero channels
    if N_pad > N:
        # Pad the point axis by replicating the first point: duplicating a
        # real point can never change the max-pool result.
        rep = jnp.broadcast_to(x[:, :1, :], (B, N_pad - N, kp))
        x = jnp.concatenate([x, rep], axis=1)
    if B_pad > B:
        x = jnp.pad(x, ((0, B_pad - B), (0, 0), (0, 0)))       # rows discarded
    x = x.astype(jnp.bfloat16)

    # --- weights: bf16 (f32 accumulation in-kernel); biases stay f32 ---------
    w1p = jnp.pad(w1, ((0, kp - k), (0, 0))).astype(jnp.bfloat16)
    w2b, w3b = w2.astype(jnp.bfloat16), w3.astype(jnp.bfloat16)
    wf1b, wf2b = wf1.astype(jnp.bfloat16), wf2.astype(jnp.bfloat16)
    wf3p = jnp.pad(wf3, ((0, 0), (0, kk_pad - kk))).astype(jnp.bfloat16)
    # Fold the identity matrix into the final bias (removes an input + an add).
    bf3_fold = bf3 + jnp.eye(k, dtype=jnp.float32).reshape(1, kk)
    bf3p = jnp.pad(bf3_fold, ((0, 0), (0, kk_pad - kk)))

    consts = (w1p, b1, w2b, b2, w3b, b3, wf1b, bf1, wf2b, bf2, wf3p, bf3p)

    def const_spec(arr):
        nd = arr.ndim
        # constant index map: the block is only DMA'd once across the grid
        return pl.BlockSpec(arr.shape, lambda b, n: (0,) * nd)

    grid = (B_pad // Bt, N_pad // Nt)

    out = pl.pallas_call(
        tnet_kernel,
        out_shape=jax.ShapeDtypeStruct((B_pad, kk_pad), jnp.float32),
        grid_spec=pltpu.PrefetchScalarGridSpec(
            num_scalar_prefetch=0,
            grid=grid,
            in_specs=[pl.BlockSpec((Bt, Nt, kp), lambda b, n: (b, n, 0))]
                     + [const_spec(c) for c in consts],
            out_specs=pl.BlockSpec((Bt, kk_pad), lambda b, n: (b, 0)),
            scratch_shapes=[pltpu.VMEM((Bt, 1024), jnp.float32)],
        ),
        compiler_params=pltpu.CompilerParams(
            dimension_semantics=("parallel", "arbitrary"),
            vmem_limit_bytes=vmem_limit_bytes,
        ),
    )(x, *consts)

    return out[:B, :kk].reshape(B, k, k)


def init_params(key, k):
    """Deterministic synthetic weights matching TNet(k) shapes (transposed for
    channels-last matmuls): conv (out,in,1)->(in,out), linear (out,in)->(in,out)."""
    ks = jax.random.split(key, 12)
    def w(kk, shape, scale):
        return scale * jax.random.normal(kk, shape, dtype=jnp.float32)
    w1  = w(ks[0],  (k, 64),      0.2)
    b1  = w(ks[1],  (1, 64),      0.1)
    w2  = w(ks[2],  (64, 128),    0.05)
    b2  = w(ks[3],  (1, 128),     0.1)
    w3  = w(ks[4],  (128, 1024),  0.03)
    b3  = w(ks[5],  (1, 1024),    0.1)
    wf1 = w(ks[6],  (1024, 512),  0.02)
    bf1 = w(ks[7],  (1, 512),     0.1)
    wf2 = w(ks[8],  (512, 256),   0.02)
    bf2 = w(ks[9],  (1, 256),     0.1)
    wf3 = w(ks[10], (256, k * k), 0.02)
    bf3 = w(ks[11], (1, k * k),   0.1)
    return (w1, b1, w2, b2, w3, b3, wf1, bf1, wf2, bf2, wf3, bf3)


def tnet_reference(x_bkn, params, k, mimic_bf16=True):
    """Plain-JAX reference mirroring the PyTorch forward (input NCW = (B,k,N)).
    With mimic_bf16=True it applies the same bf16-operand / f32-accumulate
    strategy as the kernel so the comparison is tight."""
    (w1, b1, w2, b2, w3, b3, wf1, bf1, wf2, bf2, wf3, bf3) = params
    cast = (lambda a: a.astype(jnp.bfloat16)) if mimic_bf16 else (lambda a: a)
    mm = lambda a, wt: jnp.dot(cast(a), cast(wt), preferred_element_type=jnp.float32)
    x = jnp.transpose(x_bkn, (0, 2, 1))                 # (B, N, k)
    h = jax.nn.relu(mm(x, w1) + b1)
    h = jax.nn.relu(mm(h, w2) + b2)
    h = jax.nn.relu(mm(h, w3) + b3)
    g = jnp.max(h, axis=1)                              # (B, 1024)
    f = jax.nn.relu(mm(g, wf1) + bf1)
    f = jax.nn.relu(mm(f, wf2) + bf2)
    f = mm(f, wf3) + bf3
    iden = jnp.eye(k, dtype=jnp.float32).reshape(1, k * k)
    return (f + iden).reshape(-1, k, k)


if __name__ == "__main__":
    K = 3        # nn.Conv1d(k, 64, 1) => k input channels
    B = 2        # batch
    N = 16       # number of points

    key = jax.random.PRNGKey(0)
    kx, kw = jax.random.split(key)
    # PyTorch-layout input (B, k, N)
    x_bkn = jax.random.normal(kx, (B, K, N), dtype=jnp.float32)
    params = init_params(kw, K)

    out = tnet_forward(x_bkn, params, K)
    out = jax.block_until_ready(out)

    ref = tnet_reference(x_bkn, params, K, mimic_bf16=True)
    assert out.shape == (B, K, K)
    assert jnp.allclose(out, ref, atol=1e-2, rtol=1e-2), "mismatch vs reference"

    print("KERNEL_OK")
</pallas_src>

<mosaic_0001>
module attributes {stable_mosaic.version = 11 : i64} {
  func.func @tnet_kernel(%arg0: i32, %arg1: i32, %arg2: memref<2x16x8xbf16, #tpu.memory_space<vmem>>, %arg3: memref<8x64xbf16, #tpu.memory_space<vmem>>, %arg4: memref<1x64xf32, #tpu.memory_space<vmem>>, %arg5: memref<64x128xbf16, #tpu.memory_space<vmem>>, %arg6: memref<1x128xf32, #tpu.memory_space<vmem>>, %arg7: memref<128x1024xbf16, #tpu.memory_space<vmem>>, %arg8: memref<1x1024xf32, #tpu.memory_space<vmem>>, %arg9: memref<1024x512xbf16, #tpu.memory_space<vmem>>, %arg10: memref<1x512xf32, #tpu.memory_space<vmem>>, %arg11: memref<512x256xbf16, #tpu.memory_space<vmem>>, %arg12: memref<1x256xf32, #tpu.memory_space<vmem>>, %arg13: memref<256x128xbf16, #tpu.memory_space<vmem>>, %arg14: memref<1x128xf32, #tpu.memory_space<vmem>>, %arg15: memref<2x128xf32, #tpu.memory_space<vmem>>, %arg16: memref<2x1024xf32, #tpu.memory_space<vmem>>) attributes {dimension_semantics = [#tpu.dimension_semantics<parallel>, #tpu.dimension_semantics<arbitrary>], iteration_bounds = array<i64: 1, 1>, scalar_prefetch = 0 : i64, scratch_operands = 1 : i64, tpu.core_type = #tpu.core_type<tc>, window_params = [{transform_indices = @transform_0, window_bounds = array<i64: 2, 16, 8>}, {pipeline_mode = #tpu.pipeline_mode<synchronous>, transform_indices = @transform_1, window_bounds = array<i64: 8, 64>}, {pipeline_mode = #tpu.pipeline_mode<synchronous>, transform_indices = @transform_2, window_bounds = array<i64: 1, 64>}, {pipeline_mode = #tpu.pipeline_mode<synchronous>, transform_indices = @transform_3, window_bounds = array<i64: 64, 128>}, {pipeline_mode = #tpu.pipeline_mode<synchronous>, transform_indices = @transform_4, window_bounds = array<i64: 1, 128>}, {pipeline_mode = #tpu.pipeline_mode<synchronous>, transform_indices = @transform_5, window_bounds = array<i64: 128, 1024>}, {pipeline_mode = #tpu.pipeline_mode<synchronous>, transform_indices = @transform_6, window_bounds = array<i64: 1, 1024>}, {pipeline_mode = #tpu.pipeline_mode<synchronous>, transform_indices = @transform_7, window_bounds = array<i64: 1024, 512>}, {pipeline_mode = #tpu.pipeline_mode<synchronous>, transform_indices = @transform_8, window_bounds = array<i64: 1, 512>}, {pipeline_mode = #tpu.pipeline_mode<synchronous>, transform_indices = @transform_9, window_bounds = array<i64: 512, 256>}, {pipeline_mode = #tpu.pipeline_mode<synchronous>, transform_indices = @transform_10, window_bounds = array<i64: 1, 256>}, {pipeline_mode = #tpu.pipeline_mode<synchronous>, transform_indices = @transform_11, window_bounds = array<i64: 256, 128>}, {pipeline_mode = #tpu.pipeline_mode<synchronous>, transform_indices = @transform_12, window_bounds = array<i64: 1, 128>}, {transform_indices = @transform_13, window_bounds = array<i64: 2, 128>}]} {
    %c0_i32 = arith.constant 0 : i32
    %0 = arith.cmpi eq, %arg1, %c0_i32 : i32
    %1 = arith.extui %0 : i1 to i32
    %c0_i32_0 = arith.constant 0 : i32
    %2 = arith.cmpi ne, %1, %c0_i32_0 : i32
    scf.if %2 {
      %cst_31 = arith.constant 0xFF800000 : f32
      %43 = vector.broadcast %cst_31 : f32 to vector<2x1024xf32>
      %c0_32 = arith.constant 0 : index
      %c0_33 = arith.constant 0 : index
      %44 = vector.load %arg16[%c0_32, %c0_33] : memref<2x1024xf32, #tpu.memory_space<vmem>>, vector<2x1024xf32>
      tpu.vector_store %arg16[%c0_32, %c0_33], %43 {strides = array<i32>} : memref<2x1024xf32, #tpu.memory_space<vmem>>, vector<2x1024xf32>,
    } else {
    }
    %c0 = arith.constant 0 : index
    %c0_1 = arith.constant 0 : index
    %c0_2 = arith.constant 0 : index
    %3 = vector.load %arg2[%c0, %c0_1, %c0_2] : memref<2x16x8xbf16, #tpu.memory_space<vmem>>, vector<2x16x8xbf16>
    %4 = vector.shape_cast %3 : vector<2x16x8xbf16> to vector<32x8xbf16>
    %c0_3 = arith.constant 0 : index
    %c0_4 = arith.constant 0 : index
    %5 = vector.load %arg3[%c0_3, %c0_4] : memref<8x64xbf16, #tpu.memory_space<vmem>>, vector<8x64xbf16>
    %cst = arith.constant dense<0.000000e+00> : vector<32x64xf32>
    %6 = tpu.matmul %4, %5, %cst {dimension_numbers = #tpu.dot_dimension_numbers<[1], [0], [0], [1], [0, 0, 1, 1], [], []>} : vector<32x8xbf16>, vector<8x64xbf16>, vector<32x64xf32> -> vector<32x64xf32>
    %c0_5 = arith.constant 0 : index
    %c0_6 = arith.constant 0 : index
    %7 = vector.load %arg4[%c0_5, %c0_6] : memref<1x64xf32, #tpu.memory_space<vmem>>, vector<1x64xf32>
    %8 = vector.broadcast %7 : vector<1x64xf32> to vector<32x64xf32>
    %9 = arith.addf %6, %8 : vector<32x64xf32>
    %cst_7 = arith.constant 0.000000e+00 : f32
    %10 = vector.broadcast %cst_7 : f32 to vector<32x64xf32>
    %11 = arith.maximumf %9, %10 : vector<32x64xf32>
    %12 = arith.truncf %11 : vector<32x64xf32> to vector<32x64xbf16>
    %c0_8 = arith.constant 0 : index
    %c0_9 = arith.constant 0 : index
    %13 = vector.load %arg5[%c0_8, %c0_9] : memref<64x128xbf16, #tpu.memory_space<vmem>>, vector<64x128xbf16>
    %cst_10 = arith.constant dense<0.000000e+00> : vector<32x128xf32>
    %14 = tpu.matmul %12, %13, %cst_10 {dimension_numbers = #tpu.dot_dimension_numbers<[1], [0], [0], [1], [0, 0, 1, 1], [], []>} : vector<32x64xbf16>, vector<64x128xbf16>, vector<32x128xf32> -> vector<32x128xf32>
    %c0_11 = arith.constant 0 : index
    %c0_12 = arith.constant 0 : index
    %15 = vector.load %arg6[%c0_11, %c0_12] : memref<1x128xf32, #tpu.memory_space<vmem>>, vector<1x128xf32>
    %16 = vector.broadcast %15 : vector<1x128xf32> to vector<32x128xf32>
    %17 = arith.addf %14, %16 : vector<32x128xf32>
    %cst_13 = arith.constant 0.000000e+00 : f32
    %18 = vector.broadcast %cst_13 : f32 to vector<32x128xf32>
    %19 = arith.maximumf %17, %18 : vector<32x128xf32>
    %20 = arith.truncf %19 : vector<32x128xf32> to vector<32x128xbf16>
    %c0_14 = arith.constant 0 : index
    %c0_15 = arith.constant 0 : index
    %21 = vector.load %arg7[%c0_14, %c0_15] : memref<128x1024xbf16, #tpu.memory_space<vmem>>, vector<128x1024xbf16>
    %cst_16 = arith.constant dense<0.000000e+00> : vector<32x1024xf32>
    %22 = tpu.matmul %20, %21, %cst_16 {dimension_numbers = #tpu.dot_dimension_numbers<[1], [0], [0], [1], [0, 0, 1, 1], [], []>} : vector<32x128xbf16>, vector<128x1024xbf16>, vector<32x1024xf32> -> vector<32x1024xf32>
    %c0_17 = arith.constant 0 : index
    %c0_18 = arith.constant 0 : index
    %23 = vector.load %arg8[%c0_17, %c0_18] : memref<1x1024xf32, #tpu.memory_space<vmem>>, vector<1x1024xf32>
    %24 = vector.broadcast %23 : vector<1x1024xf32> to vector<32x1024xf32>
    %25 = arith.addf %22, %24 : vector<32x1024xf32>
    %cst_19 = arith.constant 0.000000e+00 : f32
    %26 = vector.broadcast %cst_19 : f32 to vector<32x1024xf32>
    %27 = arith.maximumf %25, %26 : vector<32x1024xf32>
    %28 = vector.extract_strided_slice %27 {offsets = [0, 0], sizes = [16, 1024], strides = [1, 1]} : vector<32x1024xf32> to vector<16x1024xf32>
    %cst_20 = arith.constant dense<0xFF800000> : vector<1024xf32>
    %29 = vector.multi_reduction <maximumf>, %28, %cst_20 [0] : vector<16x1024xf32> to vector<1024xf32>
    %30 = vector.shape_cast %29 : vector<1024xf32> to vector<1x1024xf32>
    %c0_21 = arith.constant 0 : index
    %c0_22 = arith.constant 0 : index
    %31 = vector.load %arg16[%c0_21, %c0_22] : memref<2x1024xf32, #tpu.memory_space<vmem>>, vector<1x1024xf32>
    %32 = arith.maximumf %31, %30 : vector<1x1024xf32>
    %c0_23 = arith.constant 0 : index
    %c0_24 = arith.constant 0 : index
    %33 = vector.load %arg16[%c0_23, %c0_24] : memref<2x1024xf32, #tpu.memory_space<vmem>>, vector<1x1024xf32>
    tpu.vector_store %arg16[%c0_23, %c0_24], %32 {strides = array<i32>} : memref<2x1024xf32, #tpu.memory_space<vmem>>, vector<1x1024xf32>,
    %34 = vector.extract_strided_slice %27 {offsets = [16, 0], sizes = [16, 1024], strides = [1, 1]} : vector<32x1024xf32> to vector<16x1024xf32>
    %cst_25 = arith.constant dense<0xFF800000> : vector<1024xf32>
    %35 = vector.multi_reduction <maximumf>, %34, %cst_25 [0] : vector<16x1024xf32> to vector<1024xf32>
    %36 = vector.shape_cast %35 : vector<1024xf32> to vector<1x1024xf32>
    %c1 = arith.constant 1 : index
    %c0_26 = arith.constant 0 : index
    %37 = vector.load %arg16[%c1, %c0_26] : memref<2x1024xf32, #tpu.memory_space<vmem>>, vector<1x1024xf32>
    %38 = arith.maximumf %37, %36 : vector<1x1024xf32>
    %c1_27 = arith.constant 1 : index
    %c0_28 = arith.constant 0 : index
    %39 = vector.load %arg16[%c1_27, %c0_28] : memref<2x1024xf32, #tpu.memory_space<vmem>>, vector<1x1024xf32>
    tpu.vector_store %arg16[%c1_27, %c0_28], %38 {strides = array<i32>} : memref<2x1024xf32, #tpu.memory_space<vmem>>, vector<1x1024xf32>,
    %c0_i32_29 = arith.constant 0 : i32
    %40 = arith.cmpi eq, %arg1, %c0_i32_29 : i32
    %41 = arith.extui %40 : i1 to i32
    %c0_i32_30 = arith.constant 0 : i32
    %42 = arith.cmpi ne, %41, %c0_i32_30 : i32
    scf.if %42 {
      %c0_31 = arith.constant 0 : index
      %c0_32 = arith.constant 0 : index
      %43 = vector.load %arg16[%c0_31, %c0_32] : memref<2x1024xf32, #tpu.memory_space<vmem>>, vector<2x1024xf32>
      %44 = arith.truncf %43 : vector<2x1024xf32> to vector<2x1024xbf16>
      %c0_33 = arith.constant 0 : index
      %c0_34 = arith.constant 0 : index
      %45 = vector.load %arg9[%c0_33, %c0_34] : memref<1024x512xbf16, #tpu.memory_space<vmem>>, vector<1024x512xbf16>
      %cst_35 = arith.constant dense<0.000000e+00> : vector<2x512xf32>
      %46 = tpu.matmul %44, %45, %cst_35 {dimension_numbers = #tpu.dot_dimension_numbers<[1], [0], [0], [1], [0, 0, 1, 1], [], []>} : vector<2x1024xbf16>, vector<1024x512xbf16>, vector<2x512xf32> -> vector<2x512xf32>
      %c0_36 = arith.constant 0 : index
      %c0_37 = arith.constant 0 : index
      %47 = vector.load %arg10[%c0_36, %c0_37] : memref<1x512xf32, #tpu.memory_space<vmem>>, vector<1x512xf32>
      %48 = vector.broadcast %47 : vector<1x512xf32> to vector<2x512xf32>
      %49 = arith.addf %46, %48 : vector<2x512xf32>
      %cst_38 = arith.constant 0.000000e+00 : f32
      %50 = vector.broadcast %cst_38 : f32 to vector<2x512xf32>
      %51 = arith.maximumf %49, %50 : vector<2x512xf32>
      %52 = arith.truncf %51 : vector<2x512xf32> to vector<2x512xbf16>
      %c0_39 = arith.constant 0 : index
      %c0_40 = arith.constant 0 : index
      %53 = vector.load %arg11[%c0_39, %c0_40] : memref<512x256xbf16, #tpu.memory_space<vmem>>, vector<512x256xbf16>
      %cst_41 = arith.constant dense<0.000000e+00> : vector<2x256xf32>
      %54 = tpu.matmul %52, %53, %cst_41 {dimension_numbers = #tpu.dot_dimension_numbers<[1], [0], [0], [1], [0, 0, 1, 1], [], []>} : vector<2x512xbf16>, vector<512x256xbf16>, vector<2x256xf32> -> vector<2x256xf32>
      %c0_42 = arith.constant 0 : index
      %c0_43 = arith.constant 0 : index
      %55 = vector.load %arg12[%c0_42, %c0_43] : memref<1x256xf32, #tpu.memory_space<vmem>>, vector<1x256xf32>
      %56 = vector.broadcast %55 : vector<1x256xf32> to vector<2x256xf32>
      %57 = arith.addf %54, %56 : vector<2x256xf32>
      %cst_44 = arith.constant 0.000000e+00 : f32
      %58 = vector.broadcast %cst_44 : f32 to vector<2x256xf32>
      %59 = arith.maximumf %57, %58 : vector<2x256xf32>
      %60 = arith.truncf %59 : vector<2x256xf32> to vector<2x256xbf16>
      %c0_45 = arith.constant 0 : index
      %c0_46 = arith.constant 0 : index
      %61 = vector.load %arg13[%c0_45, %c0_46] : memref<256x128xbf16, #tpu.memory_space<vmem>>, vector<256x128xbf16>
      %cst_47 = arith.constant dense<0.000000e+00> : vector<2x128xf32>
      %62 = tpu.matmul %60, %61, %cst_47 {dimension_numbers = #tpu.dot_dimension_numbers<[1], [0], [0], [1], [0, 0, 1, 1], [], []>} : vector<2x256xbf16>, vector<256x128xbf16>, vector<2x128xf32> -> vector<2x128xf32>
      %c0_48 = arith.constant 0 : index
      %c0_49 = arith.constant 0 : index
      %63 = vector.load %arg14[%c0_48, %c0_49] : memref<1x128xf32, #tpu.memory_space<vmem>>, vector<1x128xf32>
      %64 = vector.broadcast %63 : vector<1x128xf32> to vector<2x128xf32>
      %65 = arith.addf %62, %64 : vector<2x128xf32>
      %c0_50 = arith.constant 0 : index
      %c0_51 = arith.constant 0 : index
      %66 = vector.load %arg15[%c0_50, %c0_51] : memref<2x128xf32, #tpu.memory_space<vmem>>, vector<2x128xf32>
      tpu.vector_store %arg15[%c0_50, %c0_51], %65 {strides = array<i32>} : memref<2x128xf32, #tpu.memory_space<vmem>>, vector<2x128xf32>,
    } else {
    }
    return
  }
  func.func @transform_0(%arg0: i32, %arg1: i32) -> (i32, i32, i32) {
    %c0_i32 = arith.constant 0 : i32
    %c0_i32_0 = arith.constant 0 : i32
    return %arg0, %arg1, %c0_i32 : i32, i32, i32
  }
  func.func @transform_1(%arg0: i32, %arg1: i32) -> (i32, i32) {
    %c0_i32 = arith.constant 0 : i32
    %c0_i32_0 = arith.constant 0 : i32
    %c0_i32_1 = arith.constant 0 : i32
    return %c0_i32, %c0_i32_0 : i32, i32
  }
  func.func @transform_2(%arg0: i32, %arg1: i32) -> (i32, i32) {
    %c0_i32 = arith.constant 0 : i32
    %c0_i32_0 = arith.constant 0 : i32
    %c0_i32_1 = arith.constant 0 : i32
    return %c0_i32, %c0_i32_0 : i32, i32
  }
  func.func @transform_3(%arg0: i32, %arg1: i32) -> (i32, i32) {
    %c0_i32 = arith.constant 0 : i32
    %c0_i32_0 = arith.constant 0 : i32
    %c0_i32_1 = arith.constant 0 : i32
    return %c0_i32, %c0_i32_0 : i32, i32
  }
  func.func @transform_4(%arg0: i32, %arg1: i32) -> (i32, i32) {
    %c0_i32 = arith.constant 0 : i32
    %c0_i32_0 = arith.constant 0 : i32
    %c0_i32_1 = arith.constant 0 : i32
    return %c0_i32, %c0_i32_0 : i32, i32
  }
  func.func @transform_5(%arg0: i32, %arg1: i32) -> (i32, i32) {
    %c0_i32 = arith.constant 0 : i32
    %c0_i32_0 = arith.constant 0 : i32
    %c0_i32_1 = arith.constant 0 : i32
    return %c0_i32, %c0_i32_0 : i32, i32
  }
  func.func @transform_6(%arg0: i32, %arg1: i32) -> (i32, i32) {
    %c0_i32 = arith.constant 0 : i32
    %c0_i32_0 = arith.constant 0 : i32
    %c0_i32_1 = arith.constant 0 : i32
    return %c0_i32, %c0_i32_0 : i32, i32
  }
  func.func @transform_7(%arg0: i32, %arg1: i32) -> (i32, i32) {
    %c0_i32 = arith.constant 0 : i32
    %c0_i32_0 = arith.constant 0 : i32
    %c0_i32_1 = arith.constant 0 : i32
    return %c0_i32, %c0_i32_0 : i32, i32
  }
  func.func @transform_8(%arg0: i32, %arg1: i32) -> (i32, i32) {
    %c0_i32 = arith.constant 0 : i32
    %c0_i32_0 = arith.constant 0 : i32
    %c0_i32_1 = arith.constant 0 : i32
    return %c0_i32, %c0_i32_0 : i32, i32
  }
  func.func @transform_9(%arg0: i32, %arg1: i32) -> (i32, i32) {
    %c0_i32 = arith.constant 0 : i32
    %c0_i32_0 = arith.constant 0 : i32
    %c0_i32_1 = arith.constant 0 : i32
    return %c0_i32, %c0_i32_0 : i32, i32
  }
  func.func @transform_10(%arg0: i32, %arg1: i32) -> (i32, i32) {
    %c0_i32 = arith.constant 0 : i32
    %c0_i32_0 = arith.constant 0 : i32
    %c0_i32_1 = arith.constant 0 : i32
    return %c0_i32, %c0_i32_0 : i32, i32
  }
  func.func @transform_11(%arg0: i32, %arg1: i32) -> (i32, i32) {
    %c0_i32 = arith.constant 0 : i32
    %c0_i32_0 = arith.constant 0 : i32
    %c0_i32_1 = arith.constant 0 : i32
    return %c0_i32, %c0_i32_0 : i32, i32
  }
  func.func @transform_12(%arg0: i32, %arg1: i32) -> (i32, i32) {
    %c0_i32 = arith.constant 0 : i32
    %c0_i32_0 = arith.constant 0 : i32
    %c0_i32_1 = arith.constant 0 : i32
    return %c0_i32, %c0_i32_0 : i32, i32
  }
  func.func @transform_13(%arg0: i32, %arg1: i32) -> (i32, i32) {
    %c0_i32 = arith.constant 0 : i32
    %c0_i32_0 = arith.constant 0 : i32
    return %arg0, %c0_i32 : i32, i32
  }
}

</mosaic_0001>

<bundles_post_ra>
// kernel: tpu_custom_call.1
= control target key start
LH: loop header
LB: loop body
LE: loop exit
PB: predicated region body
PF: predicated region fallthrough
CT: control target
= control target key end

     0   :  { %18 = vsyncpa [#allocation4], 0  ;;  %s5466_s0 = inlined_call_operand.vmem [shape: bf16[2,16,8], index: 0, kind: input, shape index: {}]   ;;  %s5467_s1 = inlined_call_operand.hbm [shape: bf16[8,64], index: 1, kind: input, shape index: {}]   ;;  %s5468_s2 = inlined_call_operand.hbm [shape: f32[1,64], index: 2, kind: input, shape index: {}]   ;;  %s5469_s3 = inlined_call_operand.vmem [shape: bf16[64,128], index: 3, kind: input, shape index: {}]   ;;  %s5470_s4 = inlined_call_operand.hbm [shape: f32[1,128], index: 4, kind: input, shape index: {}]   ;;  %s5471_s5 = inlined_call_operand.hbm [shape: bf16[128,1024], index: 5, kind: input, shape index: {}]   ;;  %s5472_s6 = inlined_call_operand.vmem [shape: f32[1,1024], index: 6, kind: input, shape index: {}]   ;;  %s5473_s7 = inlined_call_operand.hbm [shape: bf16[1024,512], index: 7, kind: input, shape index: {}]   ;;  %s5474_s8 = inlined_call_operand.vmem [shape: f32[1,512], index: 8, kind: input, shape index: {}]   ;;  %s5475_s9 = inlined_call_operand.hbm [shape: bf16[512,256], index: 9, kind: input, shape index: {}]   ;;  %s5476_s10 = inlined_call_operand.vmem [shape: f32[1,256], index: 10, kind: input, shape index: {}]   ;;  %s5477_s11 = inlined_call_operand.hbm [shape: bf16[256,128], index: 11, kind: input, shape index: {}]   ;;  %s5478_s12 = inlined_call_operand.vmem [shape: f32[1,128], index: 12, kind: input, shape index: {}]   ;;  %s5479_s13 = inlined_call_operand.hbm [shape: f32[2,128], index: 13, kind: output, shape index: {}]  }
   0x1   :  { %19 = vsyncpa [#allocation7], 0 }
   0x2   :  { %20 = vsyncpa [#allocation10], 0 }
   0x3   :  { %21 = vsyncpa [#allocation13], 0 }
   0x4   :  { %22 = vsyncpa [#allocation5], 0  ;;  %s5069_s25 = smov [#allocation6]   ;;  %s5070_s27 = smov [#allocation9]  }
   0x5   :  { %s41_s26 = sshll.u32 %s5069_s25, 4  ;;  %s62_s28 = sshll.u32 %s5070_s27, 4  ;;  %s42_s26 = int_to_ptr.vmem [resolvable:$true] %s41_s26  ;;  %s5159_s28 = int_to_ptr.vmem [resolvable:$true] %s62_s28 }
   0x6   :  { %s4883_s14 = scalar_lea.hbm %s5468_s2, 16 }
   0x7   :  { %p4884_p0 = scmp.ne.s32.totalorder %s5468_s2, %s4883_s14  ;;  %p4887_p1 = scmp.lt.u32.totalorder %s4883_s14, %s5468_s2 }
   0x9   :  { %p4889_p2 = pnand %p4887_p1, %p4884_p0 }
   0xb   :  { %4892 = shalt.err (!%p4889_p2)
}
   0xc   :  { %s4893_s19 = scalar_lea.vmem %s42_s26, 16  ;;  %s4897_s20 = scalar_lea.vmem %s42_s26, 32 }
   0xd   :  { %p4894_p3 = scmp.ne.s32.totalorder %s42_s26, %s4893_s19  ;;  %p4898_p4 = scmp.lt.s32.totalorder %s42_s26, %s42_s26 }
   0xe   :  { %p4899_p5 = scmp.lt.s32.totalorder %s4897_s20, %s4893_s19 }
  0x10   :  { %p4900_p6 = por %p4899_p5, %p4898_p4 }
  0x12   :  { %p4901_p7 = pnand %p4900_p6, %p4894_p3 }
  0x14   :  { %4904 = shalt.err (!%p4901_p7)
}
  0x15   :  { %44 = dma.hbm_to_vmem [thread:$0]  %s5468_s2, 16, %s42_s26, [#allocation7]  }
  0x16   :  { %s4905_s25 = scalar_lea.hbm %s5471_s5, 8192 }
  0x17   :  { %p4906_p8 = scmp.ne.s32.totalorder %s5471_s5, %s4905_s25  ;;  %p4909_p9 = scmp.lt.u32.totalorder %s4905_s25, %s5471_s5 }
  0x19   :  { %p4911_p10 = pnand %p4909_p9, %p4906_p8 }
  0x1b   :  { %4914 = shalt.err (!%p4911_p10)
}
  0x1c   :  { %s4915_s15 = scalar_lea.vmem %s5159_s28, 8192  ;;  %p4920_p12 = scmp.lt.s32.totalorder %s5159_s28, %s5159_s28 }
  0x1d   :  { %p4916_p11 = scmp.ne.s32.totalorder %s5159_s28, %s4915_s15  ;;  %p4921_p13 = scmp.lt.s32.totalorder %s4915_s15, %s4915_s15 }
  0x1f   :  { %p4922_p0 = por %p4921_p13, %p4920_p12 }
  0x21   :  { %p4923_p1 = pnand %p4922_p0, %p4916_p11 }
  0x23   :  { %4926 = shalt.err (!%p4923_p1)
}
  0x24   :  { %s5071_s2 = smov 512   ;;  %s5072_s26 = smov 32  }
  0x25   :  { %68 = dma.hbm_to_vmem [thread:$0]  %s5471_s5, 8192, %s5159_s28, [#allocation10], %s5071_s2, %s5071_s2, %s5072_s26  }
  0x26   :  { %s5073_s18 = smov [#allocation12]   ;;  %s4927_s22 = scalar_lea.hbm %s5475_s9, 8192 }
  0x27   :  { %s90_s19 = sshll.u32 %s5073_s18, 4  ;;  %p4928_p2 = scmp.ne.s32.totalorder %s5475_s9, %s4927_s22  ;;  %s91_s19 = int_to_ptr.vmem [resolvable:$true] %s90_s19 }
  0x28   :  { %p4931_p3 = scmp.lt.u32.totalorder %s4927_s22, %s5475_s9 }
  0x2a   :  { %p4933_p4 = pnand %p4931_p3, %p4928_p2 }
  0x2c   :  { %4936 = shalt.err (!%p4933_p4)
}
  0x2d   :  { %s4937_s29 = scalar_lea.vmem %s91_s19, 8192  ;;  %p4942_p6 = scmp.lt.s32.totalorder %s91_s19, %s91_s19 }
  0x2e   :  { %p4938_p5 = scmp.ne.s32.totalorder %s91_s19, %s4937_s29  ;;  %p4943_p7 = scmp.lt.s32.totalorder %s4937_s29, %s4937_s29 }
  0x30   :  { %p4944_p8 = por %p4943_p7, %p4942_p6 }
  0x32   :  { %p4945_p9 = pnand %p4944_p8, %p4938_p5 }
  0x34   :  { %4948 = shalt.err (!%p4945_p9)
}
  0x35   :  { %s5074_s5 = smov 128   ;;  %s5075_s28 = smov 8  }
  0x36   :  { %96 = dma.hbm_to_vmem [thread:$0]  %s5475_s9, 8192, %s91_s19, [#allocation13], %s5074_s5, %s5074_s5, %s5075_s28  }
  0x37   :  { %s5076_s15 = smov [#allocation3]   ;;  %s5077_s26 = smov [#allocation8]  }
  0x38   :  { %s31_s2 = sshll.u32 %s5076_s15, 4  ;;  %s53_s16 = sshll.u32 %s5077_s26, 4  ;;  %s32_s2 = int_to_ptr.vmem [resolvable:$true] %s31_s2  ;;  %s54_s16 = int_to_ptr.vmem [resolvable:$true] %s53_s16 }
  0x39   :  { %s4949_s20 = scalar_lea.hbm %s5467_s1, 64 }
  0x3a   :  { %p4950_p10 = scmp.ne.s32.totalorder %s5467_s1, %s4949_s20  ;;  %p4953_p11 = scmp.lt.u32.totalorder %s4949_s20, %s5467_s1 }
  0x3c   :  { %p4955_p12 = pnand %p4953_p11, %p4950_p10 }
  0x3e   :  { %4958 = shalt.err (!%p4955_p12)
}
  0x3f   :  { %s4959_s9 = scalar_lea.vmem %s32_s2, 64  ;;  %p4964_p0 = scmp.lt.s32.totalorder %s32_s2, %s32_s2 }
  0x40   :  { %p4960_p13 = scmp.ne.s32.totalorder %s32_s2, %s4959_s9  ;;  %p4965_p1 = scmp.lt.s32.totalorder %s4959_s9, %s4959_s9 }
  0x42   :  { %p4966_p2 = por %p4965_p1, %p4964_p0 }
  0x44   :  { %p4967_p3 = pnand %p4966_p2, %p4960_p13 }
  0x46   :  { %4970 = shalt.err (!%p4967_p3)
}
  0x47   :  { %34 = dma.hbm_to_vmem [thread:$0]  %s5467_s1, 64, %s32_s2, [#allocation4]  }
  0x48   :  { %s4971_s5 = scalar_lea.hbm %s5470_s4, 16 }
  0x49   :  { %p4972_p4 = scmp.ne.s32.totalorder %s5470_s4, %s4971_s5  ;;  %p4975_p5 = scmp.lt.u32.totalorder %s4971_s5, %s5470_s4 }
  0x4b   :  { %p4977_p6 = pnand %p4975_p5, %p4972_p4 }
  0x4d   :  { %4980 = shalt.err (!%p4977_p6)
}
  0x4e   :  { %s4981_s26 = scalar_lea.vmem %s54_s16, 16  ;;  %s4985_s17 = scalar_lea.vmem %s54_s16, 32 }
  0x4f   :  { %p4982_p7 = scmp.ne.s32.totalorder %s54_s16, %s4981_s26  ;;  %p4986_p8 = scmp.lt.s32.totalorder %s54_s16, %s54_s16 }
  0x50   :  { %p4987_p9 = scmp.lt.s32.totalorder %s4985_s17, %s4981_s26 }
  0x52   :  { %p4988_p10 = por %p4987_p9, %p4986_p8 }
  0x54   :  { %p4989_p11 = pnand %p4988_p10, %p4982_p7 }
  0x56   :  { %4992 = shalt.err (!%p4989_p11)
}
  0x57   :  { %56 = dma.hbm_to_vmem [thread:$0]  %s5470_s4, 16, %s54_s16, [#allocation7]  }
  0x58   :  { %s5078_s18 = smov [#allocation11]   ;;  %s4993_s23 = scalar_lea.hbm %s5473_s7, 32768 }
  0x59   :  { %s76_s20 = sshll.u32 %s5078_s18, 4  ;;  %p4994_p12 = scmp.ne.s32.totalorder %s5473_s7, %s4993_s23  ;;  %s77_s20 = int_to_ptr.vmem [resolvable:$true] %s76_s20 }
  0x5a   :  { %p4997_p13 = scmp.lt.u32.totalorder %s4993_s23, %s5473_s7 }
  0x5c   :  { %p4999_p0 = pnand %p4997_p13, %p4994_p12 }
  0x5e   :  { %5002 = shalt.err (!%p4999_p0)
}
  0x5f   :  { %s5003_s27 = scalar_lea.vmem %s77_s20, 32768  ;;  %p5008_p2 = scmp.lt.s32.totalorder %s77_s20, %s77_s20 }
  0x60   :  { %p5004_p1 = scmp.ne.s32.totalorder %s77_s20, %s5003_s27  ;;  %p5009_p3 = scmp.lt.s32.totalorder %s5003_s27, %s5003_s27 }
  0x62   :  { %p5010_p4 = por %p5009_p3, %p5008_p2 }
  0x64   :  { %p5011_p5 = pnand %p5010_p4, %p5004_p1 }
  0x66   :  { %5014 = shalt.err (!%p5011_p5)
}
  0x67   :  { %s5079_s4 = smov 256   ;;  %s5080_s16 = smov 16  }
  0x68   :  { %82 = dma.hbm_to_vmem [thread:$0]  %s5473_s7, 32768, %s77_s20, [#allocation10], %s5079_s4, %s5079_s4, %s5080_s16  }
  0x69   :  { %s5081_s28 = smov [#allocation14]   ;;  %s5015_s26 = scalar_lea.hbm %s5477_s11, 2048 }
  0x6a   :  { %s104_s30 = sshll.u32 %s5081_s28, 4  ;;  %p5016_p6 = scmp.ne.s32.totalorder %s5477_s11, %s5015_s26  ;;  %s105_s30 = int_to_ptr.vmem [resolvable:$true] %s104_s30 }
  0x6b   :  { %p5019_p7 = scmp.lt.u32.totalorder %s5015_s26, %s5477_s11 }
  0x6d   :  { %p5021_p8 = pnand %p5019_p7, %p5016_p6 }
  0x6f   :  { %5024 = shalt.err (!%p5021_p8)
}
  0x70   :  { %s5025_s21 = scalar_lea.vmem %s105_s30, 2048  ;;  %p5030_p10 = scmp.lt.s32.totalorder %s105_s30, %s105_s30 }
  0x71   :  { %p5026_p9 = scmp.ne.s32.totalorder %s105_s30, %s5025_s21  ;;  %p5031_p11 = scmp.lt.s32.totalorder %s5025_s21, %s5025_s21 }
  0x73   :  { %p5032_p12 = por %p5031_p11, %p5030_p10 }
  0x75   :  { %p5033_p13 = pnand %p5032_p12, %p5026_p9 }
  0x77   :  { %5036 = shalt.err (!%p5033_p13)
}
  0x78   :  { %s5082_s7 = smov 64   ;;  %s5083_s20 = smov 4  }
  0x79   :  { %110 = dma.hbm_to_vmem [thread:$0]  %s5477_s11, 2048, %s105_s30, [#allocation13], %s5082_s7, %s5082_s7, %s5083_s20  }
  0x7a   :  { %5059 = dma.done.wait [#allocation4], 64  }
  0x7b   :  { %5060 = vsyncadd [#allocation4], 4294967232 }
  0x7c   :  { %5061 = dma.done.wait [#allocation7], 32  }
  0x7d   :  { %5062 = vsyncadd [#allocation7], 4294967264 }
  0x7e   :  { %5063 = dma.done.wait [#allocation10], 40960  }
  0x7f   :  { %5064 = vsyncadd [#allocation10], 4294926336 }
  0x80   :  { %5065 = dma.done.wait [#allocation13], 10240  }
  0x81   :  { %5066 = vsyncadd [#allocation13], 4294957056  ;;  %vm170_vm0 = vcmask 1043456   ;;  %vm163_vm1 = vcmask 64512   ;;  %v145_v0 = vld [vmem:[#allocation3] sm:$0xf] }
  0x82   :  { %4358 = vmatprep.subr.msk.bf16.mxu1 %vm170_vm0, %v145_v0  ;;  %v172_v1 = vsel %vm170_vm0, %v145_v0, 0  ;;  %v4379_v2 = vld [vmem:[%s5466_s0] sm:$0xff]   ;;  %v4380_v3 = vld [vmem:[%s5466_s0 + $0x8] sm:$0xff]   ;;  %v4383_v6 = vld [vmem:[%s5469_s3 + $0x10] sm:$0xff]   ;;  %vm268_vm2 = vcmask 523264  }
  0x83   :  { %4307 = vmatpush3.bf16.msra.mxu1 %v172_v1  ;;  %4308 = vmatprep.mubr.msk.bf16.mxu1 %vm163_vm1, %v4379_v2  ;;  %v4381_v4 = vld [vmem:[%s5469_s3] sm:$0xff]   ;;  %v4382_v5 = vld [vmem:[%s5469_s3 + $0x8] sm:$0xff]   ;;  %v4384_v7 = vld [vmem:[%s5469_s3 + $0x18] sm:$0xff]  }
  0x84   :  { %4312 = vmatprep.subr.bf16.mxu1 %v4381_v4  ;;  %v5268_v8 = vld [vmem:[#allocation9] sm:$0xff]  ;;  %v332_v12 = vld [vmem:[#allocation9 + $0x10] sm:$0xff]  ;;  %v3862_v36 = vld [vmem:[#allocation6] ss:$0 sm:$0xff] }
  0x85   :  { %v5270_v9 = vld [vmem:[#allocation9 + $0x20] sm:$0xff]  ;;  %v336_v13 = vld [vmem:[#allocation9 + $0x30] sm:$0xff] }
  0x86   :  { %4309 = vmatmul.mubr.msk.bf16.vlgmr.msra.gmra.mrb[0].mxu1 %vm163_vm1, %v4380_v3  ;;  %v3874_v10 = vcombine.low %v5268_v8, %v5270_v9  ;;  %v3875_v11 = vcombine.high %v5268_v8, %v5270_v9  ;;  %v3879_v14 = vcombine.high %v332_v12, %v336_v13  ;;  %v3878_v15 = vcombine.low %v332_v12, %v336_v13  ;;  %v340_v16 = vld [vmem:[#allocation9 + $0x50] sm:$0xff]  ;;  %v338_v49 = vld [vmem:[#allocation9 + $0x40] sm:$0xff] }
  0x87   :  { %4313 = vmatpush3.bf16.msra.mxu1 %v4381_v4  ;;  %v344_v17 = vld [vmem:[#allocation9 + $0x70] sm:$0xff]  ;;  %v342_v50 = vld [vmem:[#allocation9 + $0x60] sm:$0xff] }
  0x88   :  { %4314 = vmatprep.subr.bf16.mxu1 %v4382_v5  ;;  %862 = vmatprep.subr.bf16.mxu0 %v3879_v14  ;;  %v3887_v18 = vcombine.high %v340_v16, %v344_v17  ;;  %v3886_v19 = vcombine.low %v340_v16, %v344_v17  ;;  %v348_v20 = vld [vmem:[#allocation9 + $0x90] sm:$0xff]  ;;  %v3883_v53 = vcombine.high %v338_v49, %v342_v50  ;;  %v346_v54 = vld [vmem:[#allocation9 + $0x80] sm:$0xff] }
  0x89   :  { %863 = vmatpush1.bf16.msra.mxu0 %v3878_v15  ;;  %v352_v21 = vld [vmem:[#allocation9 + $0xb0] sm:$0xff]  ;;  %v350_v55 = vld [vmem:[#allocation9 + $0xa0] sm:$0xff]  ;;  %v3882_v56 = vcombine.low %v338_v49, %v342_v50  ;;  %v355_v50 = vld [vmem:[#allocation9 + $0xc8] sm:$0xff] }
  0x8a   :  { %864 = vmatprep.subr.bf16.mxu0 %v3887_v18  ;;  %v3895_v22 = vcombine.high %v348_v20, %v352_v21  ;;  %v3894_v23 = vcombine.low %v348_v20, %v352_v21  ;;  %v356_v24 = vld [vmem:[#allocation9 + $0xd0] sm:$0xff]  ;;  %v3891_v57 = vcombine.high %v346_v54, %v350_v55  ;;  %v354_v58 = vld [vmem:[#allocation9 + $0xc0] sm:$0xff]  ;;  %v3890_v60 = vcombine.low %v346_v54, %v350_v55  ;;  %v363_v54 = vld [vmem:[#allocation9 + $0x108] sm:$0xff] }
  0x8b   :  { %4315 = vmatpush3.bf16.msra.mxu1 %v4382_v5  ;;  %v360_v25 = vld [vmem:[#allocation9 + $0xf0] sm:$0xff]  ;;  %v358_v59 = vld [vmem:[#allocation9 + $0xe0] sm:$0xff]  ;;  %v367_v55 = vld [vmem:[#allocation9 + $0x128] sm:$0xff] }
  0x8c   :  { %4316 = vmatprep.subr.bf16.mxu1 %v4383_v6  ;;  %v3903_v26 = vcombine.high %v356_v24, %v360_v25  ;;  %v3902_v27 = vcombine.low %v356_v24, %v360_v25  ;;  %v364_v28 = vld [vmem:[#allocation9 + $0x110] sm:$0xff]  ;;  %v3899_v61 = vcombine.high %v354_v58, %v358_v59  ;;  %v362_v62 = vld [vmem:[#allocation9 + $0x100] sm:$0xff]  ;;  %v3898_v0 = vcombine.low %v354_v58, %v358_v59  ;;  %v335_v24 = vld [vmem:[#allocation9 + $0x28] sm:$0xff] }
  0x8d   :  { %865 = vmatpush1.bf16.msra.mxu0 %v3886_v19  ;;  %v368_v29 = vld [vmem:[#allocation9 + $0x130] sm:$0xff]  ;;  %v366_v63 = vld [vmem:[#allocation9 + $0x120] sm:$0xff]  ;;  %v371_v58 = vld [vmem:[#allocation9 + $0x148] sm:$0xff] }
  0x8e   :  { %866 = vmatprep.subr.bf16.mxu0 %v3895_v22  ;;  %v3911_v30 = vcombine.high %v364_v28, %v368_v29  ;;  %v3910_v31 = vcombine.low %v364_v28, %v368_v29  ;;  %v372_v32 = vld [vmem:[#allocation9 + $0x150] sm:$0xff]  ;;  %v3907_v1 = vcombine.high %v362_v62, %v366_v63  ;;  %v370_v2 = vld [vmem:[#allocation9 + $0x140] sm:$0xff]  ;;  %v3906_v4 = vcombine.low %v362_v62, %v366_v63  ;;  %v3867_v28 = vld [vmem:[#allocation8] ss:$0 sm:$0xff] }
  0x8f   :  { %4317 = vmatpush3.bf16.msra.mxu1 %v4383_v6  ;;  %v376_v33 = vld [vmem:[#allocation9 + $0x170] sm:$0xff]  ;;  %v374_v3 = vld [vmem:[#allocation9 + $0x160] sm:$0xff]  ;;  %v375_v59 = vld [vmem:[#allocation9 + $0x168] sm:$0xff] }
  0x90   :  { %4318 = vmatprep.subr.bf16.mxu1 %v4384_v7  ;;  %v3919_v34 = vcombine.high %v372_v32, %v376_v33  ;;  %v3918_v35 = vcombine.low %v372_v32, %v376_v33  ;;  %v3915_v5 = vcombine.high %v370_v2, %v374_v3  ;;  %v3914_v6 = vcombine.low %v370_v2, %v374_v3  ;;  %v382_v8 = vld [vmem:[#allocation9 + $0x1a0] sm:$0xff]  ;;  %v388_v18 = vld [vmem:[#allocation9 + $0x1d0] sm:$0xff]  ;;  %v379_v62 = vld [vmem:[#allocation9 + $0x188] sm:$0xff] }
  0x91   :  { %867 = vmatpush1.bf16.msra.mxu0 %v3894_v23  ;;  %v386_v15 = vld [vmem:[#allocation9 + $0x1c0] sm:$0xff]  ;;  %v392_v19 = vld [vmem:[#allocation9 + $0x1f0] sm:$0xff]  ;;  %v331_v23 = vld [vmem:[#allocation9 + $0x8] sm:$0xff] }
  0x92   :  { %868 = vmatprep.subr.bf16.mxu0 %v3903_v26  ;;  %v390_v16 = vld [vmem:[#allocation9 + $0x1e0] sm:$0xff]  ;;  %v3935_v21 = vcombine.high %v388_v18, %v392_v19  ;;  %v3934_v22 = vcombine.low %v388_v18, %v392_v19  ;;  %v3877_v25 = vcombine.high %v331_v23, %v335_v24  ;;  %v3876_v26 = vcombine.low %v331_v23, %v335_v24  ;;  %v383_v63 = vld [vmem:[#allocation9 + $0x1a8] sm:$0xff]  ;;  %v357_v18 = vld [vmem:[#allocation9 + $0xd8] sm:$0xff] }
  0x93   :  { %4319 = vmatpush3.bf16.msra.mxu1 %v4384_v7  ;;  %v378_v7 = vld [vmem:[#allocation9 + $0x180] sm:$0xff]  ;;  %v3931_v17 = vcombine.high %v386_v15, %v390_v16  ;;  %v3930_v20 = vcombine.low %v386_v15, %v390_v16  ;;  %v387_v2 = vld [vmem:[#allocation9 + $0x1c8] sm:$0xff]  ;;  %v353_v15 = vld [vmem:[#allocation9 + $0xb8] sm:$0xff] }
  0x94   :  { %756 = vmatprep.subr.bf16.mxu1 %v3875_v11  ;;  %v3923_v9 = vcombine.high %v378_v7, %v382_v8  ;;  %v384_v11 = vld [vmem:[#allocation9 + $0x1b0] sm:$0xff]  ;;  %v3922_v12 = vcombine.low %v378_v7, %v382_v8  ;;  %v391_v3 = vld [vmem:[#allocation9 + $0x1e8] sm:$0xff]  ;;  %v337_v7 = vld [vmem:[#allocation9 + $0x38] sm:$0xff] }
  0x95   :  { %869 = vmatpush1.bf16.msra.mxu0 %v3902_v27  ;;  %v5084_v27 = vmov 0   ;;  %v3932_v8 = vcombine.low %v387_v2, %v391_v3  ;;  %v361_v19 = vld [vmem:[#allocation9 + $0xf8] sm:$0xff] }
  0x96   :  { %870 = vmatprep.subr.bf16.mxu0 %v3911_v30  ;;  %894 = vmatprep.mubr.bf16.mxu0 %v5084_v27  ;;  %v369_v23 = vld [vmem:[#allocation9 + $0x138] sm:$0xff]  ;;  %v3904_v24 = vcombine.low %v357_v18, %v361_v19 }
  0x99   :  { %871 = vmatpush1.bf16.msra.mxu0 %v3910_v31 }
  0x9a   :  { %872 = vmatprep.subr.bf16.mxu0 %v3919_v34 }
  0x9d   :  { %873 = vmatpush1.bf16.msra.mxu0 %v3918_v35 }
 0x159   :  { %v4310_v37 = vpop.f32.mrb[0].mxu1 }
 0x15a   :  { %v217_v38 = vadd.f32 %v4310_v37, %v3862_v36  ;;  %v208_v39 = vpop.f32.mrb[1].mxu1 }
 0x15b   :  { %v209_v40 = vadd.f32 %v3862_v36, %v208_v39  ;;  %v4311_v41 = vpop.f32.mrb[2].mxu1  ;;  %v339_v39 = vld [vmem:[#allocation9 + $0x48] sm:$0xff] }
 0x15c   :  { %v220_v42 = vadd.f32 %v4311_v41, %v3862_v36  ;;  %v211_v43 = vpop.f32.mrb[3].mxu1  ;;  %v225_v45 = vmax.f32 %v217_v38, 0.0 }
 0x15d   :  { %v212_v44 = vadd.f32 %v3862_v36, %v211_v43  ;;  %v223_v47 = vmax.f32 %v209_v40, 0.0  ;;  %v343_v40 = vld [vmem:[#allocation9 + $0x68] sm:$0xff] }
 0x15e   :  { %v226_v46 = vmax.f32 %v220_v42, 0.0 }
 0x15f   :  { %v224_v48 = vmax.f32 %v212_v44, 0.0 }
 0x160   :  { %v228_v51 = vpack.c.bf16 %v226_v46, %v225_v45  ;;  %v3885_v45 = vcombine.high %v339_v39, %v343_v40  ;;  %v347_v46 = vld [vmem:[#allocation9 + $0x88] sm:$0xff] }
 0x161   :  { %v227_v52 = vpack.c.bf16 %v224_v48, %v223_v47  ;;  %v351_v47 = vld [vmem:[#allocation9 + $0xa8] sm:$0xff]  ;;  %v3884_v48 = vcombine.low %v339_v39, %v343_v40  ;;  %v4387_v40 = vld [vmem:[#allocation11 + $0x4] ss:$16 sps:$4 sm:$0xff]  }
 0x162   :  { %v3893_v49 = vcombine.high %v347_v46, %v351_v47 }
 0x163   :  { %4320 = vmatprep.mubr.msk.bf16.mxu1 %vm268_vm2, %v227_v52  ;;  %v3892_v52 = vcombine.low %v347_v46, %v351_v47  ;;  %v4393_v46 = vld [vmem:[#allocation11 + $0x24] ss:$16 sps:$4 sm:$0xff]   ;;  %v4396_v47 = vld [vmem:[#allocation11 + $0x2c] ss:$16 sps:$4 sm:$0xff]  }
 0x164   :  { %4321 = vmatmul.mubr.msk.bf16.vlgmr.msra.gmra.mrb[4].mxu1 %vm268_vm2, %v228_v51  ;;  %v359_v51 = vld [vmem:[#allocation9 + $0xe8] sm:$0xff] }
 0x165   :  { %757 = vmatpush1.bf16.msra.mxu1 %v3874_v10  ;;  %v380_v10 = vld [vmem:[#allocation9 + $0x190] sm:$0xff]  ;;  %788 = vmatprep.mubr.bf16.mxu1 %v5084_v27 }
 0x166   :  { %758 = vmatprep.subr.bf16.mxu1 %v3883_v53  ;;  %v3927_v13 = vcombine.high %v380_v10, %v384_v11  ;;  %v3926_v14 = vcombine.low %v380_v10, %v384_v11  ;;  %v3901_v53 = vcombine.high %v355_v50, %v359_v51  ;;  %v341_v10 = vld [vmem:[#allocation9 + $0x58] sm:$0xff] }
 0x167   :  { %v345_v11 = vld [vmem:[#allocation9 + $0x78] sm:$0xff] }
 0x168   :  { %874 = vmatprep.subr.bf16.mxu0 %v3927_v13  ;;  %v3889_v13 = vcombine.high %v341_v10, %v345_v11  ;;  %v3888_v16 = vcombine.low %v341_v10, %v345_v11  ;;  %v4433_v10 = vld [vmem:[#allocation11 + $0x100] ss:$16 sps:$4 sm:$0xff]   ;;  %v4436_v11 = vld [vmem:[#allocation11 + $0x108] ss:$16 sps:$4 sm:$0xff]  }
 0x169   :  { %759 = vmatpush1.bf16.msra.mxu1 %v3882_v56  ;;  %875 = vmatpush1.bf16.msra.mxu0 %v3926_v14  ;;  %v3900_v56 = vcombine.low %v355_v50, %v359_v51  ;;  %v349_v14 = vld [vmem:[#allocation9 + $0x98] sm:$0xff]  ;;  %v4397_v50 = vld [vmem:[#allocation11 + $0x40] ss:$16 sps:$4 sm:$0xff]   ;;  %v4405_v51 = vld [vmem:[#allocation11 + $0x64] ss:$16 sps:$4 sm:$0xff]  }
 0x16a   :  { %760 = vmatprep.subr.bf16.mxu1 %v3891_v57  ;;  %876 = vmatprep.subr.bf16.mxu0 %v3935_v21  ;;  %v3909_v57 = vcombine.high %v363_v54, %v367_v55  ;;  %v3905_v21 = vcombine.high %v357_v18, %v361_v19  ;;  %v4445_v18 = vld [vmem:[#allocation11 + $0x140] ss:$16 sps:$4 sm:$0xff]   ;;  %v4448_v19 = vld [vmem:[#allocation11 + $0x148] ss:$16 sps:$4 sm:$0xff]  }
 0x16d   :  { %761 = vmatpush1.bf16.msra.mxu1 %v3890_v60  ;;  %877 = vmatpush1.bf16.msra.mxu0 %v3934_v22  ;;  %v3908_v60 = vcombine.low %v363_v54, %v367_v55  ;;  %v365_v22 = vld [vmem:[#allocation9 + $0x118] sm:$0xff]  ;;  %v4411_v55 = vld [vmem:[#allocation11 + $0x84] ss:$16 sps:$4 sm:$0xff]  }
 0x16e   :  { %762 = vmatprep.subr.bf16.mxu1 %v3899_v61  ;;  %v3917_v61 = vcombine.high %v371_v58, %v375_v59  ;;  %2850 = vmatprep.subr.bf16.mxu0 %v4387_v40  ;;  %v4406_v54 = vld [vmem:[#allocation11 + $0x68] ss:$16 sps:$4 sm:$0xff]   ;;  %v4475_v40 = vld [vmem:[#allocation11 + $0x1e0] ss:$16 sps:$4 sm:$0xff]  }
 0x171   :  { %763 = vmatpush1.bf16.msra.mxu1 %v3898_v0  ;;  %v3916_v0 = vcombine.low %v371_v58, %v375_v59  ;;  %v4412_v58 = vld [vmem:[#allocation11 + $0x88] ss:$16 sps:$4 sm:$0xff]   ;;  %v4417_v59 = vld [vmem:[#allocation11 + $0xa4] ss:$16 sps:$4 sm:$0xff]  }
 0x172   :  { %764 = vmatprep.subr.bf16.mxu1 %v3907_v1  ;;  %v3925_v1 = vcombine.high %v379_v62, %v383_v63 }
 0x175   :  { %765 = vmatpush1.bf16.msra.mxu1 %v3906_v4  ;;  %v3924_v4 = vcombine.low %v379_v62, %v383_v63  ;;  %v4418_v62 = vld [vmem:[#allocation11 + $0xa8] ss:$16 sps:$4 sm:$0xff]   ;;  %v4423_v63 = vld [vmem:[#allocation11 + $0xc4] ss:$16 sps:$4 sm:$0xff]  }
 0x176   :  { %766 = vmatprep.subr.bf16.mxu1 %v3915_v5  ;;  %v3933_v5 = vcombine.high %v387_v2, %v391_v3  ;;  %v4424_v2 = vld [vmem:[#allocation11 + $0xc8] ss:$16 sps:$4 sm:$0xff]   ;;  %v4429_v3 = vld [vmem:[#allocation11 + $0xe4] ss:$16 sps:$4 sm:$0xff]  }
 0x179   :  { %767 = vmatpush1.bf16.msra.mxu1 %v3914_v6  ;;  %v333_v6 = vld [vmem:[#allocation9 + $0x18] sm:$0xff] }
 0x17a   :  { %768 = vmatprep.subr.bf16.mxu1 %v3923_v9  ;;  %v3881_v9 = vcombine.high %v333_v6, %v337_v7 }
 0x17d   :  { %769 = vmatpush1.bf16.msra.mxu1 %v3922_v12  ;;  %v3880_v12 = vcombine.low %v333_v6, %v337_v7  ;;  %v4427_v6 = vld [vmem:[#allocation11 + $0xe0] ss:$16 sps:$4 sm:$0xff]   ;;  %v4430_v7 = vld [vmem:[#allocation11 + $0xe8] ss:$16 sps:$4 sm:$0xff]  }
 0x17e   :  { %770 = vmatprep.subr.bf16.mxu1 %v3931_v17  ;;  %v3897_v17 = vcombine.high %v349_v14, %v353_v15 }
 0x181   :  { %771 = vmatpush1.bf16.msra.mxu1 %v3930_v20  ;;  %v3896_v20 = vcombine.low %v349_v14, %v353_v15  ;;  %v4439_v14 = vld [vmem:[#allocation11 + $0x120] ss:$16 sps:$4 sm:$0xff]   ;;  %v4442_v15 = vld [vmem:[#allocation11 + $0x128] ss:$16 sps:$4 sm:$0xff]  }
 0x182   :  { %809 = vmatprep.subr.bf16.mxu1 %v3877_v25  ;;  %v3913_v25 = vcombine.high %v365_v22, %v369_v23 }
 0x237   :  { %v4322_v29 = vpop.f32.mrb[4].mxu1 }
 0x238   :  { %v318_v30 = vadd.f32 %v4322_v29, %v3867_v28  ;;  %v309_v31 = vpop.f32.mrb[5].mxu1  ;;  %v3912_v29 = vcombine.low %v365_v22, %v369_v23  ;;  %v4451_v22 = vld [vmem:[#allocation11 + $0x160] ss:$16 sps:$4 sm:$0xff]   ;;  %v4454_v23 = vld [vmem:[#allocation11 + $0x168] ss:$16 sps:$4 sm:$0xff]  }
 0x239   :  { %v310_v32 = vadd.f32 %v3867_v28, %v309_v31  ;;  %v4323_v33 = vpop.f32.mrb[6].mxu1  ;;  %v381_v31 = vld [vmem:[#allocation9 + $0x198] sm:$0xff] }
 0x23a   :  { %v321_v34 = vadd.f32 %v4323_v33, %v3867_v28  ;;  %v312_v35 = vpop.f32.mrb[7].mxu1  ;;  %v326_v37 = vmax.f32 %v318_v30, 0.0 }
 0x23b   :  { %v313_v36 = vadd.f32 %v3867_v28, %v312_v35  ;;  %v324_v41 = vmax.f32 %v310_v32, 0.0  ;;  %v377_v28 = vld [vmem:[#allocation9 + $0x178] sm:$0xff] }
 0x23c   :  { %v327_v38 = vmax.f32 %v321_v34, 0.0  ;;  %v385_v32 = vld [vmem:[#allocation9 + $0x1b8] sm:$0xff] }
 0x23d   :  { %v325_v42 = vmax.f32 %v313_v36, 0.0  ;;  %v3929_v34 = vcombine.high %v381_v31, %v385_v32  ;;  %v389_v35 = vld [vmem:[#allocation9 + $0x1d8] sm:$0xff] }
 0x23e   :  { %v5278_v43 = vpack.c.bf16 %v327_v38, %v326_v37  ;;  %v393_v36 = vld [vmem:[#allocation9 + $0x1f8] sm:$0xff]  ;;  %v3928_v37 = vcombine.low %v381_v31, %v385_v32 }
 0x23f   :  { %v5280_v44 = vpack.c.bf16 %v325_v42, %v324_v41  ;;  %v3937_v38 = vcombine.high %v389_v35, %v393_v36  ;;  %v3936_v39 = vcombine.low %v389_v35, %v393_v36  ;;  %v4390_v41 = vld [vmem:[#allocation11 + $0xc] ss:$16 sps:$4 sm:$0xff]   ;;  %v4385_v42 = vld [vmem:[#allocation11] ss:$16 sps:$4 sm:$0xff]   ;;  %v4466_v31 = vld [vmem:[#allocation11 + $0x1a8] ss:$16 sps:$4 sm:$0xff]  }
 0x240   :  { %v4468_v32 = vld [vmem:[#allocation11 + $0x1ac] ss:$16 sps:$4 sm:$0xff]   ;;  %v4469_v35 = vld [vmem:[#allocation11 + $0x1c0] ss:$16 sps:$4 sm:$0xff]   ;;  %v4472_v36 = vld [vmem:[#allocation11 + $0x1c8] ss:$16 sps:$4 sm:$0xff]  }
 0x241   :  { %789 = vmatmul.mubr.bf16.vlgmr.msra.gmra.mrb[8].mxu1 %v5280_v44  ;;  %895 = vmatmul.mubr.bf16.vlgmr.msra.gmra.mrb[0].mxu0 %v5280_v44 }
 0x242   :  { %810 = vmatpush1.bf16.msra.mxu1 %v3876_v26  ;;  %798 = vmatprep.mubr.bf16.mxu1 %v5084_v27  ;;  %v373_v26 = vld [vmem:[#allocation9 + $0x158] sm:$0xff] }
 0x243   :  { %811 = vmatprep.subr.bf16.mxu1 %v3885_v45  ;;  %904 = vmatprep.mubr.bf16.mxu0 %v5084_v27  ;;  %v3921_v30 = vcombine.high %v373_v26, %v377_v28  ;;  %v3920_v33 = vcombine.low %v373_v26, %v377_v28  ;;  %v4388_v45 = vld [vmem:[#allocation11 + $0x8] ss:$16 sps:$4 sm:$0xff]   ;;  %v4457_v26 = vld [vmem:[#allocation11 + $0x180] ss:$16 sps:$4 sm:$0xff]  }
 0x244   :  { %2851 = vmatpush1.bf16.msra.mxu0 %v4385_v42  ;;  %v4460_v28 = vld [vmem:[#allocation11 + $0x188] ss:$16 sps:$4 sm:$0xff]  }
 0x245   :  { %2852 = vmatprep.subr.bf16.mxu0 %v4393_v46  ;;  %v4486_v46 = vld [vmem:[#allocation11 + $0x20c] ss:$16 sps:$4 sm:$0xff]  }
 0x246   :  { %812 = vmatpush1.bf16.msra.mxu1 %v3884_v48  ;;  %v4391_v48 = vld [vmem:[#allocation11 + $0x20] ss:$16 sps:$4 sm:$0xff]  }
 0x247   :  { %813 = vmatprep.subr.bf16.mxu1 %v3893_v49  ;;  %v4394_v49 = vld [vmem:[#allocation11 + $0x28] ss:$16 sps:$4 sm:$0xff]  }
 0x248   :  { %2853 = vmatpush1.bf16.msra.mxu0 %v4391_v48 }
 0x249   :  { %799 = vmatmul.mubr.bf16.gmra.mrb[12].mxu1 %v5278_v43  ;;  %905 = vmatmul.mubr.bf16.gmra.mrb[4].mxu0 %v5278_v43 }
 0x24a   :  { %814 = vmatpush1.bf16.msra.mxu1 %v3892_v52  ;;  %841 = vmatprep.mubr.bf16.mxu1 %v5084_v27  ;;  %v4408_v52 = vld [vmem:[#allocation11 + $0x6c] ss:$16 sps:$4 sm:$0xff]  }
 0x24b   :  { %815 = vmatprep.subr.bf16.mxu1 %v3901_v53  ;;  %v4403_v53 = vld [vmem:[#allocation11 + $0x60] ss:$16 sps:$4 sm:$0xff]  }
 0x24e   :  { %816 = vmatpush1.bf16.msra.mxu1 %v3900_v56  ;;  %v4414_v56 = vld [vmem:[#allocation11 + $0x8c] ss:$16 sps:$4 sm:$0xff]  }
 0x24f   :  { %817 = vmatprep.subr.bf16.mxu1 %v3909_v57  ;;  %v4409_v57 = vld [vmem:[#allocation11 + $0x80] ss:$16 sps:$4 sm:$0xff]  }
 0x252   :  { %818 = vmatpush1.bf16.msra.mxu1 %v3908_v60  ;;  %v4420_v60 = vld [vmem:[#allocation11 + $0xac] ss:$16 sps:$4 sm:$0xff]  }
 0x253   :  { %819 = vmatprep.subr.bf16.mxu1 %v3917_v61  ;;  %v4415_v61 = vld [vmem:[#allocation11 + $0xa0] ss:$16 sps:$4 sm:$0xff]  }
 0x256   :  { %820 = vmatpush1.bf16.msra.mxu1 %v3916_v0  ;;  %v4426_v0 = vld [vmem:[#allocation11 + $0xcc] ss:$16 sps:$4 sm:$0xff]  }
 0x257   :  { %821 = vmatprep.subr.bf16.mxu1 %v3925_v1  ;;  %v4421_v1 = vld [vmem:[#allocation11 + $0xc0] ss:$16 sps:$4 sm:$0xff]  }
 0x25a   :  { %822 = vmatpush1.bf16.msra.mxu1 %v3924_v4  ;;  %v4432_v4 = vld [vmem:[#allocation11 + $0xec] ss:$16 sps:$4 sm:$0xff]  }
 0x25b   :  { %823 = vmatprep.subr.bf16.mxu1 %v3933_v5  ;;  %v5085_v5 = vmov -inf  }
 0x25c   :  { %139 = vst [vmem:[#allocation2] sm:$0xff] %v5085_v5  ;;  %140 = vst [vmem:[#allocation2 + $0x8] sm:$0xff] %v5085_v5 }
 0x25e   :  { %824 = vmatpush1.bf16.msra.mxu1 %v3932_v8  ;;  %v4435_v8 = vld [vmem:[#allocation11 + $0x104] ss:$16 sps:$4 sm:$0xff]  }
 0x25f   :  { %915 = vmatprep.subr.bf16.mxu1 %v3881_v9  ;;  %v4438_v9 = vld [vmem:[#allocation11 + $0x10c] ss:$16 sps:$4 sm:$0xff]  }
 0x261   :  { %842 = vmatmul.mubr.bf16.vlgmr.msra.gmra.mrb[16].mxu1 %v5280_v44 }
 0x262   :  { %916 = vmatpush1.bf16.msra.mxu1 %v3880_v12  ;;  %851 = vmatprep.mubr.bf16.mxu1 %v5084_v27  ;;  %v4441_v12 = vld [vmem:[#allocation11 + $0x124] ss:$16 sps:$4 sm:$0xff]  }
 0x263   :  { %917 = vmatprep.subr.bf16.mxu1 %v3889_v13  ;;  %v4444_v13 = vld [vmem:[#allocation11 + $0x12c] ss:$16 sps:$4 sm:$0xff]  }
 0x266   :  { %918 = vmatpush1.bf16.msra.mxu1 %v3888_v16  ;;  %v4447_v16 = vld [vmem:[#allocation11 + $0x144] ss:$16 sps:$4 sm:$0xff]  }
 0x267   :  { %919 = vmatprep.subr.bf16.mxu1 %v3897_v17  ;;  %v4450_v17 = vld [vmem:[#allocation11 + $0x14c] ss:$16 sps:$4 sm:$0xff]  }
 0x269   :  { %852 = vmatmul.mubr.bf16.gmra.mrb[20].mxu1 %v5278_v43 }
 0x26a   :  { %920 = vmatpush1.bf16.msra.mxu1 %v3896_v20  ;;  %947 = vmatprep.mubr.bf16.mxu1 %v5084_v27  ;;  %v4453_v20 = vld [vmem:[#allocation11 + $0x164] ss:$16 sps:$4 sm:$0xff]  }
 0x26b   :  { %921 = vmatprep.subr.bf16.mxu1 %v3905_v21  ;;  %v4456_v21 = vld [vmem:[#allocation11 + $0x16c] ss:$16 sps:$4 sm:$0xff]  }
 0x26e   :  { %922 = vmatpush1.bf16.msra.mxu1 %v3904_v24  ;;  %v4459_v24 = vld [vmem:[#allocation11 + $0x184] ss:$16 sps:$4 sm:$0xff]  }
 0x26f   :  { %923 = vmatprep.subr.bf16.mxu1 %v3913_v25  ;;  %v4462_v25 = vld [vmem:[#allocation11 + $0x18c] ss:$16 sps:$4 sm:$0xff]  }
 0x272   :  { %924 = vmatpush1.bf16.msra.mxu1 %v3912_v29  ;;  %v4463_v29 = vld [vmem:[#allocation11 + $0x1a0] ss:$16 sps:$4 sm:$0xff]  }
 0x273   :  { %925 = vmatprep.subr.bf16.mxu1 %v3921_v30  ;;  %v4465_v30 = vld [vmem:[#allocation11 + $0x1a4] ss:$16 sps:$4 sm:$0xff]  }
 0x276   :  { %926 = vmatpush1.bf16.msra.mxu1 %v3920_v33  ;;  %v4471_v33 = vld [vmem:[#allocation11 + $0x1c4] ss:$16 sps:$4 sm:$0xff]  }
 0x277   :  { %927 = vmatprep.subr.bf16.mxu1 %v3929_v34  ;;  %v4474_v34 = vld [vmem:[#allocation11 + $0x1cc] ss:$16 sps:$4 sm:$0xff]  }
 0x27a   :  { %928 = vmatpush1.bf16.msra.mxu1 %v3928_v37  ;;  %v4477_v37 = vld [vmem:[#allocation11 + $0x1e4] ss:$16 sps:$4 sm:$0xff]  }
 0x27b   :  { %929 = vmatprep.subr.bf16.mxu1 %v3937_v38  ;;  %v4480_v38 = vld [vmem:[#allocation11 + $0x1ec] ss:$16 sps:$4 sm:$0xff]  }
 0x27e   :  { %930 = vmatpush1.bf16.msra.mxu1 %v3936_v39  ;;  %v396_v39 = vlaneseq }
 0x27f   :  { %3014 = vmatprep.subr.bf16.mxu1 %v4390_v41  ;;  %v4478_v41 = vld [vmem:[#allocation11 + $0x1e8] ss:$16 sps:$4 sm:$0xff]  }
 0x280   :  { %v5296_v42 = vshrl.u32 %v396_v39, 7 }
 0x281   :  { %948 = vmatmul.mubr.bf16.vlgmr.msra.gmra.mrb[24].mxu1 %v5280_v44  ;;  %v4399_v44 = vld [vmem:[#allocation11 + $0x44] ss:$16 sps:$4 sm:$0xff]  }
 0x282   :  { %957 = vmatprep.mubr.bf16.mxu1 %v5084_v27  ;;  %3015 = vmatpush1.bf16.msra.mxu1 %v4388_v45  ;;  %v4402_v27 = vld [vmem:[#allocation11 + $0x4c] ss:$16 sps:$4 sm:$0xff]   ;;  %v4483_v45 = vld [vmem:[#allocation11 + $0x204] ss:$16 sps:$4 sm:$0xff]   ;;  %v414_v48 = vsub.s32 4, %v5296_v42 }
 0x283   :  { %3016 = vmatprep.subr.bf16.mxu1 %v4396_v47  ;;  %2854 = vmatprep.subr.bf16.mxu0 %v4399_v44  ;;  %v5299_v47 = vsub.s32 0, %v5296_v42  ;;  %v5308_v44 = vsub.s32 1, %v5296_v42 }
 0x284   :  { %2855 = vmatpush1.bf16.msra.mxu0 %v4397_v50 }
 0x285   :  { %2856 = vmatprep.subr.bf16.mxu0 %v4405_v51 }
 0x286   :  { %3017 = vmatpush1.bf16.msra.mxu1 %v4394_v49  ;;  %v5305_v49 = vld [vmem:[%s5472_s6] sm:$0xff] }
 0x287   :  { %3018 = vmatprep.subr.bf16.mxu1 %v4402_v27  ;;  %v418_v27 = vsub.s32 5, %v5296_v42  ;;  %v399_v50 = vrot.slane %v5305_v49, %v5299_v47  ;;  %v403_v51 = vrot.slane %v5305_v49, %v5308_v44 }
 0x288   :  { %2857 = vmatpush1.bf16.msra.mxu0 %v4403_v53 }
 0x289   :  { %958 = vmatmul.mubr.bf16.gmra.mrb[28].mxu1 %v5278_v43  ;;  %v4400_v43 = vld [vmem:[#allocation11 + $0x48] ss:$16 sps:$4 sm:$0xff]   ;;  %2858 = vmatprep.subr.bf16.mxu0 %v4411_v55 }
 0x28a   :  { %3019 = vmatpush1.bf16.msra.mxu1 %v4400_v43  ;;  %v415_v43 = vrot.slane %v5305_v49, %v414_v48 }
 0x28b   :  { %3020 = vmatprep.subr.bf16.mxu1 %v4408_v52  ;;  %v419_v52 = vrot.slane %v5305_v49, %v418_v27 }
 0x28c   :  { %2859 = vmatpush1.bf16.msra.mxu0 %v4409_v57 }
 0x28d   :  { %2860 = vmatprep.subr.bf16.mxu0 %v4417_v59 }
 0x28e   :  { %3021 = vmatpush1.bf16.msra.mxu1 %v4406_v54 }
 0x28f   :  { %3022 = vmatprep.subr.bf16.mxu1 %v4414_v56 }
 0x290   :  { %2861 = vmatpush1.bf16.msra.mxu0 %v4415_v61 }
 0x291   :  { %2862 = vmatprep.subr.bf16.mxu0 %v4423_v63 }
 0x292   :  { %3023 = vmatpush1.bf16.msra.mxu1 %v4412_v58 }
 0x293   :  { %3024 = vmatprep.subr.bf16.mxu1 %v4420_v60 }
 0x294   :  { %2863 = vmatpush1.bf16.msra.mxu0 %v4421_v1 }
 0x295   :  { %2864 = vmatprep.subr.bf16.mxu0 %v4429_v3 }
 0x296   :  { %3025 = vmatpush1.bf16.msra.mxu1 %v4418_v62 }
 0x297   :  { %3026 = vmatprep.subr.bf16.mxu1 %v4426_v0 }
 0x298   :  { %2865 = vmatpush1.bf16.msra.mxu0 %v4427_v6 }
 0x299   :  { %2866 = vmatprep.subr.bf16.mxu0 %v4435_v8 }
 0x29a   :  { %3027 = vmatpush1.bf16.msra.mxu1 %v4424_v2 }
 0x29b   :  { %3028 = vmatprep.subr.bf16.mxu1 %v4432_v4 }
 0x29c   :  { %2867 = vmatpush1.bf16.msra.mxu0 %v4433_v10 }
 0x29d   :  { %2868 = vmatprep.subr.bf16.mxu0 %v4441_v12 }
 0x29e   :  { %3029 = vmatpush1.bf16.msra.mxu1 %v4430_v7 }
 0x29f   :  { %3030 = vmatprep.subr.bf16.mxu1 %v4438_v9 }
 0x2a0   :  { %2869 = vmatpush1.bf16.msra.mxu0 %v4439_v14 }
 0x2a1   :  { %2870 = vmatprep.subr.bf16.mxu0 %v4447_v16 }
 0x2a2   :  { %3031 = vmatpush1.bf16.msra.mxu1 %v4436_v11 }
 0x2a3   :  { %3032 = vmatprep.subr.bf16.mxu1 %v4444_v13 }
 0x2a4   :  { %2871 = vmatpush1.bf16.msra.mxu0 %v4445_v18 }
 0x2a5   :  { %2872 = vmatprep.subr.bf16.mxu0 %v4453_v20 }
 0x2a6   :  { %3033 = vmatpush1.bf16.msra.mxu1 %v4442_v15 }
 0x2a7   :  { %3034 = vmatprep.subr.bf16.mxu1 %v4450_v17 }
 0x2a8   :  { %2873 = vmatpush1.bf16.msra.mxu0 %v4451_v22 }
 0x2a9   :  { %2874 = vmatprep.subr.bf16.mxu0 %v4459_v24 }
 0x2aa   :  { %3035 = vmatpush1.bf16.msra.mxu1 %v4448_v19 }
 0x2ab   :  { %3036 = vmatprep.subr.bf16.mxu1 %v4456_v21 }
 0x2ac   :  { %2875 = vmatpush1.bf16.msra.mxu0 %v4457_v26 }
 0x2ad   :  { %2876 = vmatprep.subr.bf16.mxu0 %v4465_v30 }
 0x2ae   :  { %3037 = vmatpush1.bf16.msra.mxu1 %v4454_v23 }
 0x2af   :  { %3038 = vmatprep.subr.bf16.mxu1 %v4462_v25 }
 0x2b0   :  { %2877 = vmatpush1.bf16.msra.mxu0 %v4463_v29 }
 0x2b1   :  { %2878 = vmatprep.subr.bf16.mxu0 %v4471_v33 }
 0x2b2   :  { %3039 = vmatpush1.bf16.msra.mxu1 %v4460_v28 }
 0x2b3   :  { %3040 = vmatprep.subr.bf16.mxu1 %v4468_v32 }
 0x2b4   :  { %2879 = vmatpush1.bf16.msra.mxu0 %v4469_v35 }
 0x2b5   :  { %2880 = vmatprep.subr.bf16.mxu0 %v4477_v37 }
 0x2b6   :  { %3041 = vmatpush1.bf16.msra.mxu1 %v4466_v31 }
 0x2b7   :  { %3042 = vmatprep.subr.bf16.mxu1 %v4474_v34 }
 0x2b8   :  { %2881 = vmatpush1.bf16.msra.mxu0 %v4475_v40 }
 0x2b9   :  { %2891 = vmatprep.subr.bf16.mxu0 %v4483_v45 }
 0x2ba   :  { %3043 = vmatpush1.bf16.msra.mxu1 %v4472_v36 }
 0x2bb   :  { %3044 = vmatprep.subr.bf16.mxu1 %v4480_v38 }
 0x2be   :  { %3045 = vmatpush1.bf16.msra.mxu1 %v4478_v41 }
 0x2bf   :  { %3055 = vmatprep.subr.bf16.mxu1 %v4486_v46 }
 0x314   :  { %v790_v53 = vpop.f32.mrb[8].mxu1  ;;  %v896_v54 = vpop.f32.mrb[0].mxu0 }
 0x315   :  { %v791_v55 = vadd.f32 %v790_v53, %v399_v50  ;;  %v897_v56 = vadd.f32 %v896_v54, %v415_v43  ;;  %v792_v57 = vpop.f32.mrb[9].mxu1  ;;  %v898_v58 = vpop.f32.mrb[1].mxu0 }
 0x316   :  { %v793_v59 = vadd.f32 %v792_v57, %v403_v51  ;;  %v899_v60 = vadd.f32 %v898_v58, %v419_v52  ;;  %v794_v61 = vpop.f32.mrb[10].mxu1  ;;  %v900_v62 = vpop.f32.mrb[2].mxu0 }
 0x317   :  { %v795_v63 = vadd.f32 %v794_v61, %v399_v50  ;;  %v901_v0 = vadd.f32 %v900_v62, %v415_v43  ;;  %v796_v1 = vpop.f32.mrb[11].mxu1  ;;  %v902_v2 = vpop.f32.mrb[3].mxu0  ;;  %v968_v5 = vmax.f32 %v791_v55, 0.0  ;;  %v972_v6 = vmax.f32 %v897_v56, 0.0 }
 0x318   :  { %v797_v3 = vadd.f32 %v796_v1, %v403_v51  ;;  %v903_v4 = vadd.f32 %v902_v2, %v419_v52  ;;  %v969_v9 = vmax.f32 %v793_v59, 0.0  ;;  %v973_v10 = vmax.f32 %v899_v60, 0.0 }
 0x319   :  { %v976_v7 = vmax.f32 %v795_v63, 0.0  ;;  %v980_v8 = vmax.f32 %v901_v0, 0.0 }
 0x31a   :  { %v977_v11 = vmax.f32 %v797_v3, 0.0  ;;  %v981_v12 = vmax.f32 %v903_v4, 0.0 }
 0x31b   :  { %v1000_v13 = vmax.f32 %v968_v5, %v976_v7  ;;  %v1028_v14 = vmax.f32 %v972_v6, %v980_v8 }
 0x31c   :  { %v1007_v15 = vmax.f32 %v969_v9, %v977_v11  ;;  %v1035_v16 = vmax.f32 %v973_v10, %v981_v12  ;;  %v800_v17 = vpop.f32.mrb[12].mxu1  ;;  %v906_v18 = vpop.f32.mrb[4].mxu0 }
 0x31d   :  { %v1001_v19 = vrot.slane %v1000_v13, 4  ;;  %v1029_v20 = vrot.slane %v1028_v14, 4  ;;  %v801_v21 = vadd.f32 %v800_v17, %v399_v50  ;;  %v907_v22 = vadd.f32 %v906_v18, %v415_v43  ;;  %v802_v23 = vpop.f32.mrb[13].mxu1  ;;  %v908_v24 = vpop.f32.mrb[5].mxu0 }
 0x31e   :  { %v1008_v25 = vrot.slane %v1007_v15, 4  ;;  %v1036_v26 = vrot.slane %v1035_v16, 4  ;;  %v803_v28 = vadd.f32 %v802_v23, %v403_v51  ;;  %v909_v29 = vadd.f32 %v908_v24, %v419_v52  ;;  %v804_v30 = vpop.f32.mrb[14].mxu1  ;;  %v910_v31 = vpop.f32.mrb[6].mxu0 }
 0x31f   :  { %v1002_v32 = vmax.f32 %v1000_v13, %v1001_v19  ;;  %v1030_v33 = vmax.f32 %v1028_v14, %v1029_v20  ;;  %v984_v34 = vmax.f32 %v801_v21, 0.0  ;;  %v988_v35 = vmax.f32 %v907_v22, 0.0  ;;  %v806_v36 = vpop.f32.mrb[15].mxu1  ;;  %v912_v37 = vpop.f32.mrb[7].mxu0 }
 0x320   :  { %v1009_v38 = vmax.f32 %v1007_v15, %v1008_v25  ;;  %v1037_v39 = vmax.f32 %v1035_v16, %v1036_v26  ;;  %v985_v40 = vmax.f32 %v803_v28, 0.0  ;;  %v989_v41 = vmax.f32 %v909_v29, 0.0 }
 0x321   :  { %v1003_v45 = vrot.slane %v1002_v32, 2  ;;  %v1031_v46 = vrot.slane %v1030_v33, 2  ;;  %v805_v48 = vadd.f32 %v804_v30, %v399_v50  ;;  %v911_v27 = vadd.f32 %v910_v31, %v415_v43 }
 0x322   :  { %v1010_v53 = vrot.slane %v1009_v38, 2  ;;  %v1038_v54 = vrot.slane %v1037_v39, 2  ;;  %v807_v55 = vadd.f32 %v806_v36, %v403_v51  ;;  %v913_v56 = vadd.f32 %v912_v37, %v419_v52 }
 0x323   :  { %v1004_v57 = vmax.f32 %v1002_v32, %v1003_v45  ;;  %v1032_v58 = vmax.f32 %v1030_v33, %v1031_v46  ;;  %v992_v59 = vmax.f32 %v805_v48, 0.0  ;;  %v996_v60 = vmax.f32 %v911_v27, 0.0 }
 0x324   :  { %v1011_v61 = vmax.f32 %v1009_v38, %v1010_v53  ;;  %v1039_v62 = vmax.f32 %v1037_v39, %v1038_v54  ;;  %v993_v63 = vmax.f32 %v807_v55, 0.0  ;;  %v997_v0 = vmax.f32 %v913_v56, 0.0 }
 0x325   :  { %v1005_v1 = vrot.slane %v1004_v57, 1  ;;  %v1033_v2 = vrot.slane %v1032_v58, 1  ;;  %v1117_v3 = vmax.f32 %v984_v34, %v992_v59  ;;  %v1145_v4 = vmax.f32 %v988_v35, %v996_v60 }
 0x326   :  { %v1012_v5 = vrot.slane %v1011_v61, 1  ;;  %v1040_v6 = vrot.slane %v1039_v62, 1  ;;  %v1124_v50 = vmax.f32 %v985_v40, %v993_v63  ;;  %v1152_v43 = vmax.f32 %v989_v41, %v997_v0 }
 0x327   :  { %v5317_v7 = vmax.f32 %v1004_v57, %v1005_v1  ;;  %v5319_v51 = vmax.f32 %v1032_v58, %v1033_v2  ;;  %v1118_v52 = vrot.slane %v1117_v3, 4  ;;  %v1146_v8 = vrot.slane %v1145_v4, 4 }
 0x328   :  { %v5321_v9 = vmax.f32 %v1011_v61, %v1012_v5  ;;  %v5323_v10 = vmax.f32 %v1039_v62, %v1040_v6  ;;  %v1125_v11 = vrot.slane %v1124_v50, 4  ;;  %v1153_v12 = vrot.slane %v1152_v43, 4 }
 0x329   :  { %v1119_v13 = vmax.f32 %v1117_v3, %v1118_v52  ;;  %v1147_v14 = vmax.f32 %v1145_v4, %v1146_v8  ;;  %v406_v25 = vsub.s32 2, %v5296_v42  ;;  %v410_v29 = vsub.s32 3, %v5296_v42 }
 0x32a   :  { %v1065_v15 = vcombine.low %v5317_v7, %v5321_v9  ;;  %v1067_v16 = vcombine.low %v5319_v51, %v5323_v10  ;;  %v1126_v17 = vmax.f32 %v1124_v50, %v1125_v11  ;;  %v1154_v18 = vmax.f32 %v1152_v43, %v1153_v12 }
 0x32b   :  { %v1120_v19 = vrot.slane %v1119_v13, 2  ;;  %v1148_v20 = vrot.slane %v1147_v14, 2  ;;  %v407_v36 = vrot.slane %v5305_v49, %v406_v25  ;;  %v411_v39 = vrot.slane %v5305_v49, %v410_v29 }
 0x32c   :  { %v1127_v21 = vrot.slane %v1126_v17, 2  ;;  %v1155_v22 = vrot.slane %v1154_v18, 2  ;;  %v5086_v52 = vmov 1966171168  }
 0x32d   :  { %v1121_v23 = vmax.f32 %v1119_v13, %v1120_v19  ;;  %v1149_v24 = vmax.f32 %v1147_v14, %v1148_v20  ;;  %v1070_v8 = vunpack.c.l.s4 %v5086_v52 }
 0x32e   :  { %v1128_v26 = vmax.f32 %v1126_v17, %v1127_v21  ;;  %v1156_v28 = vmax.f32 %v1154_v18, %v1155_v22 }
 0x32f   :  { %v1122_v30 = vrot.slane %v1121_v23, 1  ;;  %v1150_v31 = vrot.slane %v1149_v24, 1 }
 0x330   :  { %v1129_v32 = vrot.slane %v1128_v26, 1  ;;  %v1157_v33 = vrot.slane %v1156_v28, 1 }
 0x331   :  { %v5331_v34 = vmax.f32 %v1121_v23, %v1122_v30  ;;  %v5333_v35 = vmax.f32 %v1149_v24, %v1150_v31  ;;  %v1071_v23 = vunpack.c.0.s8 %v1070_v8 }
 0x332   :  { %v5338_v37 = vmax.f32 %v1128_v26, %v1129_v32  ;;  %v5340_v38 = vmax.f32 %v1156_v28, %v1157_v33 }
 0x334   :  { %v1183_v40 = vcombine.low %v5331_v34, %v5338_v37  ;;  %v1185_v41 = vcombine.low %v5333_v35, %v5340_v38  ;;  %v843_v45 = vpop.f32.mrb[16].mxu1 }
 0x335   :  { %v844_v46 = vadd.f32 %v843_v45, %v407_v36  ;;  %v845_v48 = vpop.f32.mrb[17].mxu1  ;;  %v5350_v45 = vsub.s32 %v1071_v23, %v5296_v42 }
 0x336   :  { %v846_v27 = vadd.f32 %v845_v48, %v411_v39  ;;  %v847_v53 = vpop.f32.mrb[18].mxu1 }
 0x337   :  { %v848_v54 = vadd.f32 %v847_v53, %v407_v36  ;;  %v849_v55 = vpop.f32.mrb[19].mxu1  ;;  %v970_v57 = vmax.f32 %v844_v46, 0.0  ;;  %v1207_v51 = vrot.slane %v1185_v41, %v5350_v45 }
 0x338   :  { %v850_v56 = vadd.f32 %v849_v55, %v411_v39  ;;  %v971_v59 = vmax.f32 %v846_v27, 0.0  ;;  %v5356_v55 = vrot.slane %v1065_v15, %v5350_v45  ;;  %v5371_v15 = vrot.slane %v1183_v40, %v5350_v45 }
 0x339   :  { %v978_v58 = vmax.f32 %v848_v54, 0.0 }
 0x33a   :  { %v979_v60 = vmax.f32 %v850_v56, 0.0 }
 0x33b   :  { %v1014_v61 = vmax.f32 %v970_v57, %v978_v58 }
 0x33c   :  { %v1021_v62 = vmax.f32 %v971_v59, %v979_v60  ;;  %v853_v63 = vpop.f32.mrb[20].mxu1  ;;  %v422_v59 = vsub.s32 6, %v5296_v42 }
 0x33d   :  { %v1015_v0 = vrot.slane %v1014_v61, 4  ;;  %v854_v1 = vadd.f32 %v853_v63, %v407_v36  ;;  %v855_v2 = vpop.f32.mrb[21].mxu1 }
 0x33e   :  { %v1022_v3 = vrot.slane %v1021_v62, 4  ;;  %v856_v4 = vadd.f32 %v855_v2, %v411_v39  ;;  %v857_v5 = vpop.f32.mrb[22].mxu1 }
 0x33f   :  { %v1016_v6 = vmax.f32 %v1014_v61, %v1015_v0  ;;  %v858_v50 = vadd.f32 %v857_v5, %v407_v36  ;;  %v859_v43 = vpop.f32.mrb[23].mxu1  ;;  %v986_v14 = vmax.f32 %v854_v1, 0.0  ;;  %v423_v1 = vrot.slane %v5305_v49, %v422_v59 }
 0x340   :  { %v1023_v11 = vmax.f32 %v1021_v62, %v1022_v3  ;;  %v860_v12 = vadd.f32 %v859_v43, %v411_v39  ;;  %v987_v19 = vmax.f32 %v856_v4, 0.0  ;;  %v426_v62 = vsub.s32 7, %v5296_v42 }
 0x341   :  { %v1017_v13 = vrot.slane %v1016_v6, 2  ;;  %v994_v17 = vmax.f32 %v858_v50, 0.0 }
 0x342   :  { %v1024_v18 = vrot.slane %v1023_v11, 2  ;;  %v995_v20 = vmax.f32 %v860_v12, 0.0  ;;  %v427_v9 = vrot.slane %v5305_v49, %v426_v62 }
 0x343   :  { %v1018_v21 = vmax.f32 %v1016_v6, %v1017_v13  ;;  %v1131_v22 = vmax.f32 %v986_v14, %v994_v17 }
 0x344   :  { %v1025_v24 = vmax.f32 %v1023_v11, %v1024_v18  ;;  %v1138_v26 = vmax.f32 %v987_v19, %v995_v20 }
 0x345   :  { %v1019_v28 = vrot.slane %v1018_v21, 1  ;;  %v1132_v30 = vrot.slane %v1131_v22, 4 }
 0x346   :  { %v1026_v31 = vrot.slane %v1025_v24, 1  ;;  %v1139_v32 = vrot.slane %v1138_v26, 4 }
 0x347   :  { %v1020_v33 = vmax.f32 %v1018_v21, %v1019_v28  ;;  %v1133_v36 = vmax.f32 %v1131_v22, %v1132_v30 }
 0x348   :  { %v1027_v39 = vmax.f32 %v1025_v24, %v1026_v31  ;;  %v1140_v46 = vmax.f32 %v1138_v26, %v1139_v32 }
 0x349   :  { %v1134_v48 = vrot.slane %v1133_v36, 2 }
 0x34a   :  { %v1066_v27 = vcombine.low %v1020_v33, %v1027_v39  ;;  %v1141_v53 = vrot.slane %v1140_v46, 2 }
 0x34b   :  { %v1135_v54 = vmax.f32 %v1133_v36, %v1134_v48 }
 0x34c   :  { %v5359_v56 = vrot.slane %v1066_v27, %v5350_v45  ;;  %v1142_v57 = vmax.f32 %v1140_v46, %v1141_v53 }
 0x34d   :  { %v1136_v58 = vrot.slane %v1135_v54, 1 }
 0x34e   :  { %v1097_v60 = vcombine.low %v5356_v55, %v5359_v56  ;;  %v1143_v61 = vrot.slane %v1142_v57, 1 }
 0x34f   :  { %v1137_v63 = vmax.f32 %v1135_v54, %v1136_v58 }
 0x350   :  { %v1144_v0 = vmax.f32 %v1142_v57, %v1143_v61 }
 0x352   :  { %v1184_v7 = vcombine.low %v1137_v63, %v1144_v0 }
 0x354   :  { %v5374_v2 = vrot.slane %v1184_v7, %v5350_v45  ;;  %v949_v3 = vpop.f32.mrb[24].mxu1 }
 0x355   :  { %v950_v4 = vadd.f32 %v949_v3, %v423_v1  ;;  %v951_v5 = vpop.f32.mrb[25].mxu1 }
 0x356   :  { %v1215_v6 = vcombine.low %v5371_v15, %v5374_v2  ;;  %v952_v50 = vadd.f32 %v951_v5, %v427_v9  ;;  %v953_v43 = vpop.f32.mrb[26].mxu1  ;;  %v1089_v5 = vrot.slane %v1067_v16, %v5350_v45 }
 0x357   :  { %v954_v52 = vadd.f32 %v953_v43, %v423_v1  ;;  %v955_v8 = vpop.f32.mrb[27].mxu1  ;;  %v974_v11 = vmax.f32 %v950_v4, 0.0 }
 0x358   :  { %v956_v49 = vadd.f32 %v955_v8, %v427_v9  ;;  %v975_v13 = vmax.f32 %v952_v50, 0.0  ;;  %v1223_v55 = vrot.slane %v1215_v6, %v5350_v45  ;;  %v4484_v6 = vld [vmem:[#allocation11 + $0x208] ss:$16 sps:$4 sm:$0xff]  }
 0x359   :  { %v982_v12 = vmax.f32 %v954_v52, 0.0 }
 0x35a   :  { %v983_v34 = vmax.f32 %v956_v49, 0.0 }
 0x35b   :  { %v1042_v37 = vmax.f32 %v974_v11, %v982_v12  ;;  %v1105_v12 = vrot.slane %v1097_v60, %v5350_v45  ;;  %v1174_v60 = vld [vmem:[#allocation2 + $0x1] ss:$2 sm:$0xff] }
 0x35c   :  { %v1049_v40 = vmax.f32 %v975_v13, %v983_v34  ;;  %v959_v14 = vpop.f32.mrb[28].mxu1 }
 0x35d   :  { %v1043_v17 = vrot.slane %v1042_v37, 4  ;;  %v960_v18 = vadd.f32 %v959_v14, %v423_v1  ;;  %v961_v19 = vpop.f32.mrb[29].mxu1 }
 0x35e   :  { %v1050_v20 = vrot.slane %v1049_v40, 4  ;;  %v962_v21 = vadd.f32 %v961_v19, %v427_v9  ;;  %v963_v22 = vpop.f32.mrb[30].mxu1  ;;  %v5087_v19 = vmov 1983009808  }
 0x35f   :  { %v1044_v23 = vmax.f32 %v1042_v37, %v1043_v17  ;;  %v964_v24 = vadd.f32 %v963_v22, %v423_v1  ;;  %v965_v26 = vpop.f32.mrb[31].mxu1  ;;  %v990_v32 = vmax.f32 %v960_v18, 0.0  ;;  %v1056_v37 = vld [vmem:[#allocation2] ss:$2 sm:$0xff] }
 0x360   :  { %v1051_v28 = vmax.f32 %v1049_v40, %v1050_v20  ;;  %v966_v30 = vadd.f32 %v965_v26, %v427_v9  ;;  %v991_v39 = vmax.f32 %v962_v21, 0.0  ;;  %v1244_v20 = vunpack.c.l.s4 %v5087_v19  ;;  %v4551_v19 = vld [vmem:[#allocation11 + $0x368] ss:$16 sps:$4 sm:$0xff]  }
 0x361   :  { %v1045_v31 = vrot.slane %v1044_v23, 2  ;;  %v998_v33 = vmax.f32 %v964_v24, 0.0 }
 0x362   :  { %v1052_v36 = vrot.slane %v1051_v28, 2  ;;  %v999_v46 = vmax.f32 %v966_v30, 0.0  ;;  %v1245_v35 = vunpack.c.0.s8 %v1244_v20  ;;  %v4556_v20 = vld [vmem:[#allocation11 + $0x384] ss:$16 sps:$4 sm:$0xff]  }
 0x363   :  { %v1046_v48 = vmax.f32 %v1044_v23, %v1045_v31  ;;  %v1159_v27 = vmax.f32 %v990_v32, %v998_v33  ;;  %v4490_v31 = vld [vmem:[#allocation11 + $0x224] ss:$16 sps:$4 sm:$0xff]   ;;  %v4493_v32 = vld [vmem:[#allocation11 + $0x22c] ss:$16 sps:$4 sm:$0xff]   ;;  %v4488_v33 = vld [vmem:[#allocation11 + $0x220] ss:$16 sps:$4 sm:$0xff]  }
 0x364   :  { %v1053_v53 = vmax.f32 %v1051_v28, %v1052_v36  ;;  %v1166_v54 = vmax.f32 %v991_v39, %v999_v46  ;;  %v5399_v38 = vsub.s32 %v1245_v35, %v5296_v42  ;;  %v4491_v36 = vld [vmem:[#allocation11 + $0x228] ss:$16 sps:$4 sm:$0xff]   ;;  %v4496_v39 = vld [vmem:[#allocation11 + $0x244] ss:$16 sps:$4 sm:$0xff]   ;;  %v4499_v46 = vld [vmem:[#allocation11 + $0x24c] ss:$16 sps:$4 sm:$0xff]  }
 0x365   :  { %v1047_v57 = vrot.slane %v1046_v48, 1  ;;  %v1160_v58 = vrot.slane %v1159_v27, 4  ;;  %v4554_v35 = vld [vmem:[#allocation11 + $0x380] ss:$16 sps:$4 sm:$0xff]   ;;  %v4881_v42 = vld [vmem:[#allocation14 + $0x78] sm:$0xff]  }
 0x366   :  { %v1054_v59 = vrot.slane %v1053_v53, 1  ;;  %v1167_v61 = vrot.slane %v1166_v54, 4 }
 0x367   :  { %v1048_v62 = vmax.f32 %v1046_v48, %v1047_v57  ;;  %v1161_v63 = vmax.f32 %v1159_v27, %v1160_v58  ;;  %v4494_v48 = vld [vmem:[#allocation11 + $0x240] ss:$16 sps:$4 sm:$0xff]   ;;  %v4497_v27 = vld [vmem:[#allocation11 + $0x248] ss:$16 sps:$4 sm:$0xff]  }
 0x368   :  { %v1055_v0 = vmax.f32 %v1053_v53, %v1054_v59  ;;  %v1168_v1 = vmax.f32 %v1166_v54, %v1167_v61  ;;  %v4502_v53 = vld [vmem:[#allocation11 + $0x264] ss:$16 sps:$4 sm:$0xff]   ;;  %v4505_v54 = vld [vmem:[#allocation11 + $0x26c] ss:$16 sps:$4 sm:$0xff]   ;;  %v4500_v57 = vld [vmem:[#allocation11 + $0x260] ss:$16 sps:$4 sm:$0xff]  }
 0x369   :  { %v1162_v7 = vrot.slane %v1161_v63, 2  ;;  %v4503_v58 = vld [vmem:[#allocation11 + $0x268] ss:$16 sps:$4 sm:$0xff]   ;;  %v4508_v59 = vld [vmem:[#allocation11 + $0x284] ss:$16 sps:$4 sm:$0xff]  }
 0x36a   :  { %v1068_v9 = vcombine.low %v1048_v62, %v1055_v0  ;;  %v1169_v3 = vrot.slane %v1168_v1, 2  ;;  %v4511_v61 = vld [vmem:[#allocation11 + $0x28c] ss:$16 sps:$4 sm:$0xff]   ;;  %v4506_v62 = vld [vmem:[#allocation11 + $0x280] ss:$16 sps:$4 sm:$0xff]  }
 0x36b   :  { %v1163_v4 = vmax.f32 %v1161_v63, %v1162_v7  ;;  %v4509_v63 = vld [vmem:[#allocation11 + $0x288] ss:$16 sps:$4 sm:$0xff]   ;;  %v4514_v0 = vld [vmem:[#allocation11 + $0x2a4] ss:$16 sps:$4 sm:$0xff]   ;;  %v4512_v7 = vld [vmem:[#allocation11 + $0x2a0] ss:$16 sps:$4 sm:$0xff]  }
 0x36c   :  { %v1096_v50 = vrot.slane %v1068_v9, %v5350_v45  ;;  %v1170_v43 = vmax.f32 %v1168_v1, %v1169_v3  ;;  %v4517_v1 = vld [vmem:[#allocation11 + $0x2ac] ss:$16 sps:$4 sm:$0xff]   ;;  %v4515_v9 = vld [vmem:[#allocation11 + $0x2a8] ss:$16 sps:$4 sm:$0xff]   ;;  %v4520_v3 = vld [vmem:[#allocation11 + $0x2c4] ss:$16 sps:$4 sm:$0xff]  }
 0x36d   :  { %v1164_v52 = vrot.slane %v1163_v4, 1 }
 0x36e   :  { %v1098_v8 = vcombine.low %v1089_v5, %v1096_v50  ;;  %v1171_v49 = vrot.slane %v1170_v43, 1  ;;  %v4518_v5 = vld [vmem:[#allocation11 + $0x2c0] ss:$16 sps:$4 sm:$0xff]   ;;  %v4521_v50 = vld [vmem:[#allocation11 + $0x2c8] ss:$16 sps:$4 sm:$0xff]  }
 0x36f   :  { %v1165_v11 = vmax.f32 %v1163_v4, %v1164_v52  ;;  %v4523_v4 = vld [vmem:[#allocation11 + $0x2cc] ss:$16 sps:$4 sm:$0xff]  }
 0x370   :  { %v1112_v13 = vrot.slane %v1098_v8, %v5350_v45  ;;  %v1172_v34 = vmax.f32 %v1170_v43, %v1171_v49  ;;  %v4526_v43 = vld [vmem:[#allocation11 + $0x2e4] ss:$16 sps:$4 sm:$0xff]   ;;  %v4529_v52 = vld [vmem:[#allocation11 + $0x2ec] ss:$16 sps:$4 sm:$0xff]   ;;  %v4524_v8 = vld [vmem:[#allocation11 + $0x2e0] ss:$16 sps:$4 sm:$0xff]  }
 0x371   :  { %v4527_v49 = vld [vmem:[#allocation11 + $0x2e8] ss:$16 sps:$4 sm:$0xff]  }
 0x372   :  { %v1113_v40 = vcombine.low %v1105_v12, %v1112_v13  ;;  %v1186_v14 = vcombine.low %v1165_v11, %v1172_v34  ;;  %v4532_v11 = vld [vmem:[#allocation11 + $0x304] ss:$16 sps:$4 sm:$0xff]   ;;  %v4535_v12 = vld [vmem:[#allocation11 + $0x30c] ss:$16 sps:$4 sm:$0xff]   ;;  %v4530_v13 = vld [vmem:[#allocation11 + $0x300] ss:$16 sps:$4 sm:$0xff]  }
 0x373   :  { %v4533_v34 = vld [vmem:[#allocation11 + $0x308] ss:$16 sps:$4 sm:$0xff]  }
 0x374   :  { %v1115_v10 = vmax.f32 %v1056_v37, %v1113_v40  ;;  %v1214_v16 = vrot.slane %v1186_v14, %v5350_v45  ;;  %v4538_v37 = vld [vmem:[#allocation11 + $0x324] ss:$16 sps:$4 sm:$0xff]   ;;  %v4541_v40 = vld [vmem:[#allocation11 + $0x32c] ss:$16 sps:$4 sm:$0xff]   ;;  %v4536_v14 = vld [vmem:[#allocation11 + $0x320] ss:$16 sps:$4 sm:$0xff]  }
 0x376   :  { %1116 = vst [vmem:[#allocation2] ss:$2 sm:$0xff] %v1115_v10  ;;  %v1216_v17 = vcombine.low %v1207_v51, %v1214_v16  ;;  %v4539_v51 = vld [vmem:[#allocation11 + $0x328] ss:$16 sps:$4 sm:$0xff]   ;;  %v4544_v10 = vld [vmem:[#allocation11 + $0x344] ss:$16 sps:$4 sm:$0xff]  }
 0x377   :  { %v4547_v16 = vld [vmem:[#allocation11 + $0x34c] ss:$16 sps:$4 sm:$0xff]  }
 0x378   :  { %v1230_v56 = vrot.slane %v1216_v17, %v5350_v45  ;;  %v4481_v45 = vld [vmem:[#allocation11 + $0x200] ss:$16 sps:$4 sm:$0xff]  }
 0x379   :  { %v4542_v17 = vld [vmem:[#allocation11 + $0x340] ss:$16 sps:$4 sm:$0xff]  }
 0x37a   :  { %v1231_v18 = vcombine.low %v1223_v55, %v1230_v56  ;;  %v4545_v55 = vld [vmem:[#allocation11 + $0x348] ss:$16 sps:$4 sm:$0xff]   ;;  %v4550_v56 = vld [vmem:[#allocation11 + $0x364] ss:$16 sps:$4 sm:$0xff]  }
 0x37c   :  { %v1233_v21 = vmax.f32 %v1174_v60, %v1231_v18  ;;  %v4553_v60 = vld [vmem:[#allocation11 + $0x36c] ss:$16 sps:$4 sm:$0xff]   ;;  %v4548_v18 = vld [vmem:[#allocation11 + $0x360] ss:$16 sps:$4 sm:$0xff]  }
 0x37e   :  { %1234 = vst [vmem:[#allocation2 + $0x1] ss:$2 sm:$0xff] %v1233_v21  ;;  %v4559_v21 = vld [vmem:[#allocation11 + $0x38c] ss:$16 sps:$4 sm:$0xff]  }
 0x385   :  { %v1238_v41 = vld [vmem:[#allocation2] sm:$0xff] }
 0x386   :  { %v1249_v22 = vrot.slane %v1238_v41, %v5399_v38  ;;  %v1242_v23 = vcombine.high %v1238_v41, %v1238_v41  ;;  %v4557_v41 = vld [vmem:[#allocation11 + $0x388] ss:$16 sps:$4 sm:$0xff]  }
 0x388   :  { %v1257_v24 = vcombine.high %v1249_v22, %v1249_v22  ;;  %v5403_v15 = vrot.slane %v1242_v23, %v5399_v38  ;;  %v1284_v28 = vpack.c.bf16 %v1249_v22, %v1249_v22  ;;  %v4562_v22 = vld [vmem:[#allocation11 + $0x3a4] ss:$16 sps:$4 sm:$0xff]   ;;  %v4565_v23 = vld [vmem:[#allocation11 + $0x3ac] ss:$16 sps:$4 sm:$0xff]  }
 0x38a   :  { %v1285_v2 = vpack.c.bf16 %v1257_v24, %v1257_v24  ;;  %v1258_v26 = vcombine.high %v5403_v15, %v5403_v15  ;;  %v4560_v24 = vld [vmem:[#allocation11 + $0x3a0] ss:$16 sps:$4 sm:$0xff]  }
 0x38c   :  { %2882 = vmatprep.mubr.bf16.mxu0 %v1285_v2  ;;  %3046 = vmatprep.mubr.bf16.mxu1 %v1285_v2  ;;  %v1287_v30 = vpack.c.bf16 %v1258_v26, %v1258_v26  ;;  %v4563_v2 = vld [vmem:[#allocation11 + $0x3a8] ss:$16 sps:$4 sm:$0xff]   ;;  %v5407_v26 = vld [vmem:[#allocation2 + $0x8] sm:$0xff] }
 0x38d   :  { %2883 = vmatmul.mubr.bf16.vlgmr.msra.gmra.mrb[8].mxu0 %v1284_v28  ;;  %3047 = vmatmul.mubr.bf16.vlgmr.msra.gmra.mrb[32].mxu1 %v1284_v28  ;;  %v4566_v28 = vld [vmem:[#allocation11 + $0x3c0] ss:$16 sps:$4 sm:$0xff]  }
 0x38e   :  { %2892 = vmatpush1.bf16.msra.mxu0 %v4481_v45  ;;  %3056 = vmatpush1.bf16.msra.mxu1 %v4484_v6  ;;  %v4568_v45 = vld [vmem:[#allocation11 + $0x3c4] ss:$16 sps:$4 sm:$0xff]   ;;  %v4571_v6 = vld [vmem:[#allocation11 + $0x3cc] ss:$16 sps:$4 sm:$0xff]  }
 0x38f   :  { %2923 = vmatprep.mubr.bf16.mxu0 %v1287_v30  ;;  %3087 = vmatprep.mubr.bf16.mxu1 %v1287_v30  ;;  %v4569_v30 = vld [vmem:[#allocation11 + $0x3c8] ss:$16 sps:$4 sm:$0xff]  }
 0x390   :  { %2893 = vmatprep.subr.bf16.mxu0 %v4490_v31  ;;  %3057 = vmatprep.subr.bf16.mxu1 %v4493_v32  ;;  %v4574_v31 = vld [vmem:[#allocation11 + $0x3e4] ss:$16 sps:$4 sm:$0xff]   ;;  %v4577_v32 = vld [vmem:[#allocation11 + $0x3ec] ss:$16 sps:$4 sm:$0xff]  }
 0x392   :  { %2894 = vmatpush1.bf16.msra.mxu0 %v4488_v33  ;;  %3058 = vmatpush1.bf16.msra.mxu1 %v4491_v36  ;;  %v5411_v33 = vrot.slane %v5407_v26, %v5399_v38  ;;  %v4572_v36 = vld [vmem:[#allocation11 + $0x3e0] ss:$16 sps:$4 sm:$0xff]  }
 0x393   :  { %2895 = vmatprep.subr.bf16.mxu0 %v4496_v39  ;;  %3059 = vmatprep.subr.bf16.mxu1 %v4499_v46  ;;  %v4575_v39 = vld [vmem:[#allocation11 + $0x3e8] ss:$16 sps:$4 sm:$0xff]   ;;  %v4580_v46 = vld [vmem:[#allocation11 + $0x404] ss:$16 sps:$4 sm:$0xff]  }
 0x396   :  { %2896 = vmatpush1.bf16.msra.mxu0 %v4494_v48  ;;  %3060 = vmatpush1.bf16.msra.mxu1 %v4497_v27  ;;  %v4583_v48 = vld [vmem:[#allocation11 + $0x40c] ss:$16 sps:$4 sm:$0xff]   ;;  %v1274_v27 = vcombine.high %v5411_v33, %v5411_v33 }
 0x397   :  { %2897 = vmatprep.subr.bf16.mxu0 %v4502_v53  ;;  %3061 = vmatprep.subr.bf16.mxu1 %v4505_v54  ;;  %v4578_v53 = vld [vmem:[#allocation11 + $0x400] ss:$16 sps:$4 sm:$0xff]   ;;  %v1286_v54 = vpack.c.bf16 %v5403_v15, %v5403_v15 }
 0x398   :  { %v4590_v15 = vld [vmem:[#allocation11 + $0x440] ss:$16 sps:$4 sm:$0xff]  }
 0x39a   :  { %2898 = vmatpush1.bf16.msra.mxu0 %v4500_v57  ;;  %3062 = vmatpush1.bf16.msra.mxu1 %v4503_v58  ;;  %v4581_v57 = vld [vmem:[#allocation11 + $0x408] ss:$16 sps:$4 sm:$0xff]   ;;  %v1289_v58 = vpack.c.bf16 %v1274_v27, %v1274_v27 }
 0x39b   :  { %2899 = vmatprep.subr.bf16.mxu0 %v4508_v59  ;;  %3063 = vmatprep.subr.bf16.mxu1 %v4511_v61  ;;  %v4586_v59 = vld [vmem:[#allocation11 + $0x424] ss:$16 sps:$4 sm:$0xff]   ;;  %v4589_v61 = vld [vmem:[#allocation11 + $0x42c] ss:$16 sps:$4 sm:$0xff]   ;;  %v4659_v27 = vld [vmem:[#allocation11 + $0x5a8] ss:$16 sps:$4 sm:$0xff]  }
 0x39e   :  { %2900 = vmatpush1.bf16.msra.mxu0 %v4506_v62  ;;  %3064 = vmatpush1.bf16.msra.mxu1 %v4509_v63  ;;  %v4584_v62 = vld [vmem:[#allocation11 + $0x420] ss:$16 sps:$4 sm:$0xff]   ;;  %v4587_v63 = vld [vmem:[#allocation11 + $0x428] ss:$16 sps:$4 sm:$0xff]  }
 0x39f   :  { %2901 = vmatprep.subr.bf16.mxu0 %v4514_v0  ;;  %3065 = vmatprep.subr.bf16.mxu1 %v4517_v1  ;;  %v4592_v0 = vld [vmem:[#allocation11 + $0x444] ss:$16 sps:$4 sm:$0xff]   ;;  %v4595_v1 = vld [vmem:[#allocation11 + $0x44c] ss:$16 sps:$4 sm:$0xff]  }
 0x3a2   :  { %2902 = vmatpush1.bf16.msra.mxu0 %v4512_v7  ;;  %3066 = vmatpush1.bf16.msra.mxu1 %v4515_v9  ;;  %v4593_v7 = vld [vmem:[#allocation11 + $0x448] ss:$16 sps:$4 sm:$0xff]   ;;  %v4598_v9 = vld [vmem:[#allocation11 + $0x464] ss:$16 sps:$4 sm:$0xff]  }
 0x3a3   :  { %2903 = vmatprep.subr.bf16.mxu0 %v4520_v3  ;;  %3067 = vmatprep.subr.bf16.mxu1 %v4523_v4  ;;  %v4601_v3 = vld [vmem:[#allocation11 + $0x46c] ss:$16 sps:$4 sm:$0xff]   ;;  %v4596_v4 = vld [vmem:[#allocation11 + $0x460] ss:$16 sps:$4 sm:$0xff]  }
 0x3a6   :  { %2904 = vmatpush1.bf16.msra.mxu0 %v4518_v5  ;;  %3068 = vmatpush1.bf16.msra.mxu1 %v4521_v50  ;;  %v4599_v5 = vld [vmem:[#allocation11 + $0x468] ss:$16 sps:$4 sm:$0xff]   ;;  %v4604_v50 = vld [vmem:[#allocation11 + $0x484] ss:$16 sps:$4 sm:$0xff]  }
 0x3a7   :  { %2905 = vmatprep.subr.bf16.mxu0 %v4526_v43  ;;  %3069 = vmatprep.subr.bf16.mxu1 %v4529_v52  ;;  %v4607_v43 = vld [vmem:[#allocation11 + $0x48c] ss:$16 sps:$4 sm:$0xff]   ;;  %v4602_v52 = vld [vmem:[#allocation11 + $0x480] ss:$16 sps:$4 sm:$0xff]  }
 0x3aa   :  { %2906 = vmatpush1.bf16.msra.mxu0 %v4524_v8  ;;  %3070 = vmatpush1.bf16.msra.mxu1 %v4527_v49  ;;  %v4605_v8 = vld [vmem:[#allocation11 + $0x488] ss:$16 sps:$4 sm:$0xff]   ;;  %v4610_v49 = vld [vmem:[#allocation11 + $0x4a4] ss:$16 sps:$4 sm:$0xff]  }
 0x3ab   :  { %2907 = vmatprep.subr.bf16.mxu0 %v4532_v11  ;;  %3071 = vmatprep.subr.bf16.mxu1 %v4535_v12  ;;  %v4613_v11 = vld [vmem:[#allocation11 + $0x4ac] ss:$16 sps:$4 sm:$0xff]   ;;  %v4608_v12 = vld [vmem:[#allocation11 + $0x4a0] ss:$16 sps:$4 sm:$0xff]  }
 0x3ae   :  { %2908 = vmatpush1.bf16.msra.mxu0 %v4530_v13  ;;  %3072 = vmatpush1.bf16.msra.mxu1 %v4533_v34  ;;  %v4611_v13 = vld [vmem:[#allocation11 + $0x4a8] ss:$16 sps:$4 sm:$0xff]   ;;  %v4616_v34 = vld [vmem:[#allocation11 + $0x4c4] ss:$16 sps:$4 sm:$0xff]  }
 0x3af   :  { %2909 = vmatprep.subr.bf16.mxu0 %v4538_v37  ;;  %3073 = vmatprep.subr.bf16.mxu1 %v4541_v40  ;;  %v4619_v37 = vld [vmem:[#allocation11 + $0x4cc] ss:$16 sps:$4 sm:$0xff]   ;;  %v4614_v40 = vld [vmem:[#allocation11 + $0x4c0] ss:$16 sps:$4 sm:$0xff]  }
 0x3b2   :  { %2910 = vmatpush1.bf16.msra.mxu0 %v4536_v14  ;;  %3074 = vmatpush1.bf16.msra.mxu1 %v4539_v51  ;;  %v4617_v14 = vld [vmem:[#allocation11 + $0x4c8] ss:$16 sps:$4 sm:$0xff]   ;;  %v4622_v51 = vld [vmem:[#allocation11 + $0x4e4] ss:$16 sps:$4 sm:$0xff]  }
 0x3b3   :  { %2911 = vmatprep.subr.bf16.mxu0 %v4544_v10  ;;  %3075 = vmatprep.subr.bf16.mxu1 %v4547_v16  ;;  %v4625_v10 = vld [vmem:[#allocation11 + $0x4ec] ss:$16 sps:$4 sm:$0xff]   ;;  %v4620_v16 = vld [vmem:[#allocation11 + $0x4e0] ss:$16 sps:$4 sm:$0xff]  }
 0x3b6   :  { %2912 = vmatpush1.bf16.msra.mxu0 %v4542_v17  ;;  %3076 = vmatpush1.bf16.msra.mxu1 %v4545_v55  ;;  %v4623_v17 = vld [vmem:[#allocation11 + $0x4e8] ss:$16 sps:$4 sm:$0xff]   ;;  %v4628_v55 = vld [vmem:[#allocation11 + $0x504] ss:$16 sps:$4 sm:$0xff]  }
 0x3b7   :  { %2913 = vmatprep.subr.bf16.mxu0 %v4550_v56  ;;  %3077 = vmatprep.subr.bf16.mxu1 %v4553_v60  ;;  %v4631_v56 = vld [vmem:[#allocation11 + $0x50c] ss:$16 sps:$4 sm:$0xff]   ;;  %v4626_v60 = vld [vmem:[#allocation11 + $0x500] ss:$16 sps:$4 sm:$0xff]  }
 0x3ba   :  { %2914 = vmatpush1.bf16.msra.mxu0 %v4548_v18  ;;  %3078 = vmatpush1.bf16.msra.mxu1 %v4551_v19  ;;  %v4629_v18 = vld [vmem:[#allocation11 + $0x508] ss:$16 sps:$4 sm:$0xff]   ;;  %v4634_v19 = vld [vmem:[#allocation11 + $0x524] ss:$16 sps:$4 sm:$0xff]  }
 0x3bb   :  { %2915 = vmatprep.subr.bf16.mxu0 %v4556_v20  ;;  %3079 = vmatprep.subr.bf16.mxu1 %v4559_v21  ;;  %v4637_v20 = vld [vmem:[#allocation11 + $0x52c] ss:$16 sps:$4 sm:$0xff]   ;;  %v4632_v21 = vld [vmem:[#allocation11 + $0x520] ss:$16 sps:$4 sm:$0xff]  }
 0x3be   :  { %2916 = vmatpush1.bf16.msra.mxu0 %v4554_v35  ;;  %3080 = vmatpush1.bf16.msra.mxu1 %v4557_v41  ;;  %v4635_v35 = vld [vmem:[#allocation11 + $0x528] ss:$16 sps:$4 sm:$0xff]   ;;  %v4640_v41 = vld [vmem:[#allocation11 + $0x544] ss:$16 sps:$4 sm:$0xff]  }
 0x3bf   :  { %2917 = vmatprep.subr.bf16.mxu0 %v4562_v22  ;;  %3081 = vmatprep.subr.bf16.mxu1 %v4565_v23  ;;  %v4643_v22 = vld [vmem:[#allocation11 + $0x54c] ss:$16 sps:$4 sm:$0xff]   ;;  %v4638_v23 = vld [vmem:[#allocation11 + $0x540] ss:$16 sps:$4 sm:$0xff]  }
 0x3c2   :  { %2918 = vmatpush1.bf16.msra.mxu0 %v4560_v24  ;;  %3082 = vmatpush1.bf16.msra.mxu1 %v4563_v2  ;;  %v4641_v24 = vld [vmem:[#allocation11 + $0x548] ss:$16 sps:$4 sm:$0xff]   ;;  %v4646_v2 = vld [vmem:[#allocation11 + $0x564] ss:$16 sps:$4 sm:$0xff]  }
 0x3c3   :  { %2919 = vmatprep.subr.bf16.mxu0 %v4568_v45  ;;  %3083 = vmatprep.subr.bf16.mxu1 %v4571_v6  ;;  %v4649_v45 = vld [vmem:[#allocation11 + $0x56c] ss:$16 sps:$4 sm:$0xff]   ;;  %v4644_v6 = vld [vmem:[#allocation11 + $0x560] ss:$16 sps:$4 sm:$0xff]  }
 0x3c6   :  { %2920 = vmatpush1.bf16.msra.mxu0 %v4566_v28  ;;  %3084 = vmatpush1.bf16.msra.mxu1 %v4569_v30  ;;  %v4647_v28 = vld [vmem:[#allocation11 + $0x568] ss:$16 sps:$4 sm:$0xff]   ;;  %v4652_v30 = vld [vmem:[#allocation11 + $0x584] ss:$16 sps:$4 sm:$0xff]  }
 0x3c7   :  { %2921 = vmatprep.subr.bf16.mxu0 %v4574_v31  ;;  %3085 = vmatprep.subr.bf16.mxu1 %v4577_v32  ;;  %v4655_v31 = vld [vmem:[#allocation11 + $0x58c] ss:$16 sps:$4 sm:$0xff]   ;;  %v4650_v32 = vld [vmem:[#allocation11 + $0x580] ss:$16 sps:$4 sm:$0xff]  }
 0x3ca   :  { %2922 = vmatpush1.bf16.msra.mxu0 %v4572_v36  ;;  %3086 = vmatpush1.bf16.msra.mxu1 %v4575_v39  ;;  %v4653_v36 = vld [vmem:[#allocation11 + $0x588] ss:$16 sps:$4 sm:$0xff]   ;;  %v4658_v39 = vld [vmem:[#allocation11 + $0x5a4] ss:$16 sps:$4 sm:$0xff]  }
 0x3cb   :  { %2932 = vmatprep.subr.bf16.mxu0 %v4580_v46  ;;  %3096 = vmatprep.subr.bf16.mxu1 %v4583_v48  ;;  %v4661_v46 = vld [vmem:[#allocation11 + $0x5ac] ss:$16 sps:$4 sm:$0xff]   ;;  %v4656_v48 = vld [vmem:[#allocation11 + $0x5a0] ss:$16 sps:$4 sm:$0xff]  }
 0x3cd   :  { %2924 = vmatmul.mubr.bf16.vlgmr.msra.gmra.mrb[8].mxu0 %v1286_v54  ;;  %3088 = vmatmul.mubr.bf16.vlgmr.msra.gmra.mrb[32].mxu1 %v1286_v54  ;;  %v4667_v54 = vld [vmem:[#allocation11 + $0x5cc] ss:$16 sps:$4 sm:$0xff]  }
 0x3ce   :  { %2933 = vmatpush1.bf16.msra.mxu0 %v4578_v53  ;;  %2964 = vmatprep.mubr.bf16.mxu0 %v1289_v58  ;;  %v4664_v53 = vld [vmem:[#allocation11 + $0x5c4] ss:$16 sps:$4 sm:$0xff]  }
 0x3cf   :  { %3097 = vmatpush1.bf16.msra.mxu1 %v4581_v57  ;;  %3128 = vmatprep.mubr.bf16.mxu1 %v1289_v58  ;;  %v1259_v57 = vcombine.high %v5407_v26, %v5407_v26  ;;  %v4662_v58 = vld [vmem:[#allocation11 + $0x5c0] ss:$16 sps:$4 sm:$0xff]  }
 0x3d0   :  { %2934 = vmatprep.subr.bf16.mxu0 %v4586_v59  ;;  %3098 = vmatprep.subr.bf16.mxu1 %v4589_v61  ;;  %v4665_v59 = vld [vmem:[#allocation11 + $0x5c8] ss:$16 sps:$4 sm:$0xff]   ;;  %v4670_v61 = vld [vmem:[#allocation11 + $0x5e4] ss:$16 sps:$4 sm:$0xff]  }
 0x3d2   :  { %2935 = vmatpush1.bf16.msra.mxu0 %v4584_v62  ;;  %v4673_v62 = vld [vmem:[#allocation11 + $0x5ec] ss:$16 sps:$4 sm:$0xff]  }
 0x3d3   :  { %3099 = vmatpush1.bf16.msra.mxu1 %v4587_v63  ;;  %2936 = vmatprep.subr.bf16.mxu0 %v4592_v0  ;;  %v5420_v63 = vrot.slane %v1259_v57, %v5399_v38  ;;  %v4668_v0 = vld [vmem:[#allocation11 + $0x5e0] ss:$16 sps:$4 sm:$0xff]   ;;  %v4677_v38 = vld [vmem:[#allocation11 + $0x608] ss:$16 sps:$4 sm:$0xff]   ;;  %v4749_v57 = vld [vmem:[#allocation11 + $0x784] ss:$16 sps:$4 sm:$0xff]  }
 0x3d4   :  { %3100 = vmatprep.subr.bf16.mxu1 %v4595_v1  ;;  %v4671_v1 = vld [vmem:[#allocation11 + $0x5e8] ss:$16 sps:$4 sm:$0xff]  }
 0x3d5   :  { %v1275_v26 = vcombine.high %v5420_v63, %v5420_v63 }
 0x3d6   :  { %2937 = vmatpush1.bf16.msra.mxu0 %v4590_v15  ;;  %v4676_v15 = vld [vmem:[#allocation11 + $0x604] ss:$16 sps:$4 sm:$0xff]  }
 0x3d7   :  { %3101 = vmatpush1.bf16.msra.mxu1 %v4593_v7  ;;  %2938 = vmatprep.subr.bf16.mxu0 %v4598_v9  ;;  %v4679_v7 = vld [vmem:[#allocation11 + $0x60c] ss:$16 sps:$4 sm:$0xff]   ;;  %v4674_v9 = vld [vmem:[#allocation11 + $0x600] ss:$16 sps:$4 sm:$0xff]  }
 0x3d8   :  { %3102 = vmatprep.subr.bf16.mxu1 %v4601_v3  ;;  %v1288_v3 = vpack.c.bf16 %v5411_v33, %v5411_v33  ;;  %v4687_v33 = vld [vmem:[#allocation11 + $0x640] ss:$16 sps:$4 sm:$0xff]  }
 0x3da   :  { %2939 = vmatpush1.bf16.msra.mxu0 %v4596_v4  ;;  %v4683_v4 = vld [vmem:[#allocation11 + $0x624] ss:$16 sps:$4 sm:$0xff]  }
 0x3db   :  { %3103 = vmatpush1.bf16.msra.mxu1 %v4599_v5  ;;  %2940 = vmatprep.subr.bf16.mxu0 %v4604_v50  ;;  %v1291_v5 = vpack.c.bf16 %v1275_v26, %v1275_v26  ;;  %v4686_v50 = vld [vmem:[#allocation11 + $0x62c] ss:$16 sps:$4 sm:$0xff]  }
 0x3dc   :  { %3104 = vmatprep.subr.bf16.mxu1 %v4607_v43  ;;  %v4681_v43 = vld [vmem:[#allocation11 + $0x620] ss:$16 sps:$4 sm:$0xff]   ;;  %v4764_v26 = vld [vmem:[#allocation11 + $0x7cc] ss:$16 sps:$4 sm:$0xff]  }
 0x3de   :  { %2941 = vmatpush1.bf16.msra.mxu0 %v4602_v52  ;;  %v4684_v52 = vld [vmem:[#allocation11 + $0x628] ss:$16 sps:$4 sm:$0xff]  }
 0x3df   :  { %3105 = vmatpush1.bf16.msra.mxu1 %v4605_v8  ;;  %2942 = vmatprep.subr.bf16.mxu0 %v4610_v49  ;;  %v4689_v8 = vld [vmem:[#allocation11 + $0x644] ss:$16 sps:$4 sm:$0xff]   ;;  %v4692_v49 = vld [vmem:[#allocation11 + $0x64c] ss:$16 sps:$4 sm:$0xff]  }
 0x3e0   :  { %3106 = vmatprep.subr.bf16.mxu1 %v4613_v11  ;;  %v4690_v11 = vld [vmem:[#allocation11 + $0x648] ss:$16 sps:$4 sm:$0xff]  }
 0x3e2   :  { %2943 = vmatpush1.bf16.msra.mxu0 %v4608_v12  ;;  %v4695_v12 = vld [vmem:[#allocation11 + $0x664] ss:$16 sps:$4 sm:$0xff]  }
 0x3e3   :  { %3107 = vmatpush1.bf16.msra.mxu1 %v4611_v13  ;;  %2944 = vmatprep.subr.bf16.mxu0 %v4616_v34  ;;  %v4698_v13 = vld [vmem:[#allocation11 + $0x66c] ss:$16 sps:$4 sm:$0xff]   ;;  %v4693_v34 = vld [vmem:[#allocation11 + $0x660] ss:$16 sps:$4 sm:$0xff]  }
 0x3e4   :  { %3108 = vmatprep.subr.bf16.mxu1 %v4619_v37  ;;  %v4696_v37 = vld [vmem:[#allocation11 + $0x668] ss:$16 sps:$4 sm:$0xff]  }
 0x3e6   :  { %2945 = vmatpush1.bf16.msra.mxu0 %v4614_v40  ;;  %v4701_v40 = vld [vmem:[#allocation11 + $0x684] ss:$16 sps:$4 sm:$0xff]  }
 0x3e7   :  { %3109 = vmatpush1.bf16.msra.mxu1 %v4617_v14  ;;  %2946 = vmatprep.subr.bf16.mxu0 %v4622_v51  ;;  %v4704_v14 = vld [vmem:[#allocation11 + $0x68c] ss:$16 sps:$4 sm:$0xff]   ;;  %v4699_v51 = vld [vmem:[#allocation11 + $0x680] ss:$16 sps:$4 sm:$0xff]  }
 0x3e8   :  { %3110 = vmatprep.subr.bf16.mxu1 %v4625_v10  ;;  %v4702_v10 = vld [vmem:[#allocation11 + $0x688] ss:$16 sps:$4 sm:$0xff]  }
 0x3ea   :  { %2947 = vmatpush1.bf16.msra.mxu0 %v4620_v16  ;;  %v4707_v16 = vld [vmem:[#allocation11 + $0x6a4] ss:$16 sps:$4 sm:$0xff]  }
 0x3eb   :  { %3111 = vmatpush1.bf16.msra.mxu1 %v4623_v17  ;;  %2948 = vmatprep.subr.bf16.mxu0 %v4628_v55  ;;  %v4710_v17 = vld [vmem:[#allocation11 + $0x6ac] ss:$16 sps:$4 sm:$0xff]   ;;  %v4705_v55 = vld [vmem:[#allocation11 + $0x6a0] ss:$16 sps:$4 sm:$0xff]  }
 0x3ec   :  { %3112 = vmatprep.subr.bf16.mxu1 %v4631_v56  ;;  %v4708_v56 = vld [vmem:[#allocation11 + $0x6a8] ss:$16 sps:$4 sm:$0xff]  }
 0x3ee   :  { %2949 = vmatpush1.bf16.msra.mxu0 %v4626_v60  ;;  %v4713_v60 = vld [vmem:[#allocation11 + $0x6c4] ss:$16 sps:$4 sm:$0xff]  }
 0x3ef   :  { %3113 = vmatpush1.bf16.msra.mxu1 %v4629_v18  ;;  %2950 = vmatprep.subr.bf16.mxu0 %v4634_v19  ;;  %v4716_v18 = vld [vmem:[#allocation11 + $0x6cc] ss:$16 sps:$4 sm:$0xff]   ;;  %v4711_v19 = vld [vmem:[#allocation11 + $0x6c0] ss:$16 sps:$4 sm:$0xff]  }
 0x3f0   :  { %3114 = vmatprep.subr.bf16.mxu1 %v4637_v20  ;;  %v4714_v20 = vld [vmem:[#allocation11 + $0x6c8] ss:$16 sps:$4 sm:$0xff]  }
 0x3f2   :  { %2951 = vmatpush1.bf16.msra.mxu0 %v4632_v21  ;;  %v4719_v21 = vld [vmem:[#allocation11 + $0x6e4] ss:$16 sps:$4 sm:$0xff]  }
 0x3f3   :  { %3115 = vmatpush1.bf16.msra.mxu1 %v4635_v35  ;;  %2952 = vmatprep.subr.bf16.mxu0 %v4640_v41  ;;  %v4722_v35 = vld [vmem:[#allocation11 + $0x6ec] ss:$16 sps:$4 sm:$0xff]   ;;  %v4717_v41 = vld [vmem:[#allocation11 + $0x6e0] ss:$16 sps:$4 sm:$0xff]  }
 0x3f4   :  { %3116 = vmatprep.subr.bf16.mxu1 %v4643_v22  ;;  %v4720_v22 = vld [vmem:[#allocation11 + $0x6e8] ss:$16 sps:$4 sm:$0xff]  }
 0x3f6   :  { %2953 = vmatpush1.bf16.msra.mxu0 %v4638_v23  ;;  %v4725_v23 = vld [vmem:[#allocation11 + $0x704] ss:$16 sps:$4 sm:$0xff]  }
 0x3f7   :  { %3117 = vmatpush1.bf16.msra.mxu1 %v4641_v24  ;;  %2954 = vmatprep.subr.bf16.mxu0 %v4646_v2  ;;  %v4728_v24 = vld [vmem:[#allocation11 + $0x70c] ss:$16 sps:$4 sm:$0xff]   ;;  %v4723_v2 = vld [vmem:[#allocation11 + $0x700] ss:$16 sps:$4 sm:$0xff]  }
 0x3f8   :  { %3118 = vmatprep.subr.bf16.mxu1 %v4649_v45  ;;  %v4726_v45 = vld [vmem:[#allocation11 + $0x708] ss:$16 sps:$4 sm:$0xff]  }
 0x3fa   :  { %2955 = vmatpush1.bf16.msra.mxu0 %v4644_v6  ;;  %v4731_v6 = vld [vmem:[#allocation11 + $0x724] ss:$16 sps:$4 sm:$0xff]  }
 0x3fb   :  { %3119 = vmatpush1.bf16.msra.mxu1 %v4647_v28  ;;  %2956 = vmatprep.subr.bf16.mxu0 %v4652_v30  ;;  %v4734_v28 = vld [vmem:[#allocation11 + $0x72c] ss:$16 sps:$4 sm:$0xff]   ;;  %v4729_v30 = vld [vmem:[#allocation11 + $0x720] ss:$16 sps:$4 sm:$0xff]  }
 0x3fc   :  { %3120 = vmatprep.subr.bf16.mxu1 %v4655_v31  ;;  %v4732_v31 = vld [vmem:[#allocation11 + $0x728] ss:$16 sps:$4 sm:$0xff]  }
 0x3fe   :  { %2957 = vmatpush1.bf16.msra.mxu0 %v4650_v32  ;;  %v4737_v32 = vld [vmem:[#allocation11 + $0x744] ss:$16 sps:$4 sm:$0xff]  }
 0x3ff   :  { %3121 = vmatpush1.bf16.msra.mxu1 %v4653_v36  ;;  %2958 = vmatprep.subr.bf16.mxu0 %v4658_v39  ;;  %v4740_v36 = vld [vmem:[#allocation11 + $0x74c] ss:$16 sps:$4 sm:$0xff]   ;;  %v4735_v39 = vld [vmem:[#allocation11 + $0x740] ss:$16 sps:$4 sm:$0xff]  }
 0x400   :  { %3122 = vmatprep.subr.bf16.mxu1 %v4661_v46  ;;  %v4738_v46 = vld [vmem:[#allocation11 + $0x748] ss:$16 sps:$4 sm:$0xff]  }
 0x402   :  { %2959 = vmatpush1.bf16.msra.mxu0 %v4656_v48  ;;  %v4743_v48 = vld [vmem:[#allocation11 + $0x764] ss:$16 sps:$4 sm:$0xff]  }
 0x403   :  { %3123 = vmatpush1.bf16.msra.mxu1 %v4659_v27  ;;  %2960 = vmatprep.subr.bf16.mxu0 %v4664_v53  ;;  %v4746_v27 = vld [vmem:[#allocation11 + $0x76c] ss:$16 sps:$4 sm:$0xff]   ;;  %v4741_v53 = vld [vmem:[#allocation11 + $0x760] ss:$16 sps:$4 sm:$0xff]  }
 0x404   :  { %3124 = vmatprep.subr.bf16.mxu1 %v4667_v54  ;;  %v4744_v54 = vld [vmem:[#allocation11 + $0x768] ss:$16 sps:$4 sm:$0xff]  }
 0x406   :  { %2961 = vmatpush1.bf16.msra.mxu0 %v4662_v58  ;;  %v4752_v58 = vld [vmem:[#allocation11 + $0x78c] ss:$16 sps:$4 sm:$0xff]  }
 0x407   :  { %3125 = vmatpush1.bf16.msra.mxu1 %v4665_v59  ;;  %2962 = vmatprep.subr.bf16.mxu0 %v4670_v61  ;;  %v4747_v59 = vld [vmem:[#allocation11 + $0x780] ss:$16 sps:$4 sm:$0xff]   ;;  %v4750_v61 = vld [vmem:[#allocation11 + $0x788] ss:$16 sps:$4 sm:$0xff]  }
 0x408   :  { %3126 = vmatprep.subr.bf16.mxu1 %v4673_v62  ;;  %v4755_v62 = vld [vmem:[#allocation11 + $0x7a4] ss:$16 sps:$4 sm:$0xff]  }
 0x40a   :  { %2963 = vmatpush1.bf16.msra.mxu0 %v4668_v0  ;;  %v4758_v0 = vld [vmem:[#allocation11 + $0x7ac] ss:$16 sps:$4 sm:$0xff]  }
 0x40b   :  { %3127 = vmatpush1.bf16.msra.mxu1 %v4671_v1  ;;  %2973 = vmatprep.subr.bf16.mxu0 %v4676_v15  ;;  %v4753_v1 = vld [vmem:[#allocation11 + $0x7a0] ss:$16 sps:$4 sm:$0xff]   ;;  %v4756_v15 = vld [vmem:[#allocation11 + $0x7a8] ss:$16 sps:$4 sm:$0xff]  }
 0x40c   :  { %3137 = vmatprep.subr.bf16.mxu1 %v4679_v7  ;;  %v4761_v7 = vld [vmem:[#allocation11 + $0x7c4] ss:$16 sps:$4 sm:$0xff]  }
 0x40d   :  { %2965 = vmatmul.mubr.bf16.vlgmr.msra.gmra.mrb[8].mxu0 %v1288_v3 }
 0x40e   :  { %3129 = vmatmul.mubr.bf16.vlgmr.msra.gmra.mrb[32].mxu1 %v1288_v3  ;;  %2974 = vmatpush1.bf16.msra.mxu0 %v4674_v9  ;;  %v4759_v9 = vld [vmem:[#allocation11 + $0x7c0] ss:$16 sps:$4 sm:$0xff]   ;;  %v4762_v3 = vld [vmem:[#allocation11 + $0x7c8] ss:$16 sps:$4 sm:$0xff]  }
 0x40f   :  { %3005 = vmatprep.mubr.bf16.mxu0 %v1291_v5  ;;  %3138 = vmatpush1.bf16.msra.mxu1 %v4677_v38  ;;  %v4767_v38 = vld [vmem:[#allocation11 + $0x7e4] ss:$16 sps:$4 sm:$0xff]  }
 0x410   :  { %3169 = vmatprep.mubr.bf16.mxu1 %v1291_v5  ;;  %2975 = vmatprep.subr.bf16.mxu0 %v4683_v4  ;;  %v4770_v4 = vld [vmem:[#allocation11 + $0x7ec] ss:$16 sps:$4 sm:$0xff]   ;;  %v4765_v5 = vld [vmem:[#allocation11 + $0x7e0] ss:$16 sps:$4 sm:$0xff]  }
 0x411   :  { %3139 = vmatprep.subr.bf16.mxu1 %v4686_v50  ;;  %v4768_v50 = vld [vmem:[#allocation11 + $0x7e8] ss:$16 sps:$4 sm:$0xff]  }
 0x412   :  { %2976 = vmatpush1.bf16.msra.mxu0 %v4681_v43  ;;  %v4773_v43 = vld [vmem:[#allocation12 + $0x4] ss:$8 sps:$4 sm:$0xff]  }
 0x413   :  { %3140 = vmatpush1.bf16.msra.mxu1 %v4684_v52  ;;  %2977 = vmatprep.subr.bf16.mxu0 %v4689_v8  ;;  %v4771_v52 = vld [vmem:[#allocation12] ss:$8 sps:$4 sm:$0xff]   ;;  %v1290_v8 = vpack.c.bf16 %v5420_v63, %v5420_v63  ;;  %v4788_v63 = vld [vmem:[#allocation12 + $0x54] ss:$8 sps:$4 sm:$0xff]  }
 0x414   :  { %3141 = vmatprep.subr.bf16.mxu1 %v4692_v49  ;;  %v4776_v49 = vld [vmem:[#allocation12 + $0x14] ss:$8 sps:$4 sm:$0xff]  }
 0x416   :  { %2978 = vmatpush1.bf16.msra.mxu0 %v4687_v33  ;;  %v4774_v33 = vld [vmem:[#allocation12 + $0x10] ss:$8 sps:$4 sm:$0xff]  }
 0x417   :  { %3142 = vmatpush1.bf16.msra.mxu1 %v4690_v11  ;;  %2979 = vmatprep.subr.bf16.mxu0 %v4695_v12  ;;  %v4779_v11 = vld [vmem:[#allocation12 + $0x24] ss:$8 sps:$4 sm:$0xff]   ;;  %v4777_v12 = vld [vmem:[#allocation12 + $0x20] ss:$8 sps:$4 sm:$0xff]  }
 0x418   :  { %3143 = vmatprep.subr.bf16.mxu1 %v4698_v13  ;;  %v4782_v13 = vld [vmem:[#allocation12 + $0x34] ss:$8 sps:$4 sm:$0xff]  }
 0x41a   :  { %2980 = vmatpush1.bf16.msra.mxu0 %v4693_v34  ;;  %v4780_v34 = vld [vmem:[#allocation12 + $0x30] ss:$8 sps:$4 sm:$0xff]  }
 0x41b   :  { %3144 = vmatpush1.bf16.msra.mxu1 %v4696_v37  ;;  %2981 = vmatprep.subr.bf16.mxu0 %v4701_v40  ;;  %v4785_v37 = vld [vmem:[#allocation12 + $0x44] ss:$8 sps:$4 sm:$0xff]   ;;  %v4783_v40 = vld [vmem:[#allocation12 + $0x40] ss:$8 sps:$4 sm:$0xff]  }
 0x41c   :  { %3145 = vmatprep.subr.bf16.mxu1 %v4704_v14  ;;  %v4786_v14 = vld [vmem:[#allocation12 + $0x50] ss:$8 sps:$4 sm:$0xff]  }
 0x41e   :  { %2982 = vmatpush1.bf16.msra.mxu0 %v4699_v51  ;;  %v4791_v51 = vld [vmem:[#allocation12 + $0x64] ss:$8 sps:$4 sm:$0xff]  }
 0x41f   :  { %3146 = vmatpush1.bf16.msra.mxu1 %v4702_v10  ;;  %2983 = vmatprep.subr.bf16.mxu0 %v4707_v16  ;;  %v4789_v10 = vld [vmem:[#allocation12 + $0x60] ss:$8 sps:$4 sm:$0xff]   ;;  %v4794_v16 = vld [vmem:[#allocation12 + $0x74] ss:$8 sps:$4 sm:$0xff]  }
 0x420   :  { %3147 = vmatprep.subr.bf16.mxu1 %v4710_v17  ;;  %v4792_v17 = vld [vmem:[#allocation12 + $0x70] ss:$8 sps:$4 sm:$0xff]  }
 0x422   :  { %2984 = vmatpush1.bf16.msra.mxu0 %v4705_v55  ;;  %v4797_v55 = vld [vmem:[#allocation12 + $0x84] ss:$8 sps:$4 sm:$0xff]  }
 0x423   :  { %3148 = vmatpush1.bf16.msra.mxu1 %v4708_v56  ;;  %2985 = vmatprep.subr.bf16.mxu0 %v4713_v60  ;;  %v4795_v56 = vld [vmem:[#allocation12 + $0x80] ss:$8 sps:$4 sm:$0xff]   ;;  %v4800_v60 = vld [vmem:[#allocation12 + $0x94] ss:$8 sps:$4 sm:$0xff]  }
 0x424   :  { %3149 = vmatprep.subr.bf16.mxu1 %v4716_v18  ;;  %v4798_v18 = vld [vmem:[#allocation12 + $0x90] ss:$8 sps:$4 sm:$0xff]  }
 0x426   :  { %2986 = vmatpush1.bf16.msra.mxu0 %v4711_v19  ;;  %v4803_v19 = vld [vmem:[#allocation12 + $0xa4] ss:$8 sps:$4 sm:$0xff]  }
 0x427   :  { %3150 = vmatpush1.bf16.msra.mxu1 %v4714_v20  ;;  %2987 = vmatprep.subr.bf16.mxu0 %v4719_v21  ;;  %v4801_v20 = vld [vmem:[#allocation12 + $0xa0] ss:$8 sps:$4 sm:$0xff]   ;;  %v4806_v21 = vld [vmem:[#allocation12 + $0xb4] ss:$8 sps:$4 sm:$0xff]  }
 0x428   :  { %3151 = vmatprep.subr.bf16.mxu1 %v4722_v35  ;;  %v4804_v35 = vld [vmem:[#allocation12 + $0xb0] ss:$8 sps:$4 sm:$0xff]  }
 0x42a   :  { %2988 = vmatpush1.bf16.msra.mxu0 %v4717_v41  ;;  %v4809_v41 = vld [vmem:[#allocation12 + $0xc4] ss:$8 sps:$4 sm:$0xff]  }
 0x42b   :  { %3152 = vmatpush1.bf16.msra.mxu1 %v4720_v22  ;;  %2989 = vmatprep.subr.bf16.mxu0 %v4725_v23  ;;  %v4807_v22 = vld [vmem:[#allocation12 + $0xc0] ss:$8 sps:$4 sm:$0xff]   ;;  %v4812_v23 = vld [vmem:[#allocation12 + $0xd4] ss:$8 sps:$4 sm:$0xff]  }
 0x42c   :  { %3153 = vmatprep.subr.bf16.mxu1 %v4728_v24  ;;  %v4810_v24 = vld [vmem:[#allocation12 + $0xd0] ss:$8 sps:$4 sm:$0xff]  }
 0x42e   :  { %2990 = vmatpush1.bf16.msra.mxu0 %v4723_v2  ;;  %v4815_v2 = vld [vmem:[#allocation12 + $0xe4] ss:$8 sps:$4 sm:$0xff]  }
 0x42f   :  { %3154 = vmatpush1.bf16.msra.mxu1 %v4726_v45  ;;  %2991 = vmatprep.subr.bf16.mxu0 %v4731_v6  ;;  %v4813_v45 = vld [vmem:[#allocation12 + $0xe0] ss:$8 sps:$4 sm:$0xff]   ;;  %v4818_v6 = vld [vmem:[#allocation12 + $0xf4] ss:$8 sps:$4 sm:$0xff]  }
 0x430   :  { %3155 = vmatprep.subr.bf16.mxu1 %v4734_v28  ;;  %v4816_v28 = vld [vmem:[#allocation12 + $0xf0] ss:$8 sps:$4 sm:$0xff]  }
 0x432   :  { %2992 = vmatpush1.bf16.msra.mxu0 %v4729_v30  ;;  %v4821_v30 = vld [vmem:[#allocation12 + $0x104] ss:$8 sps:$4 sm:$0xff]  }
 0x433   :  { %3156 = vmatpush1.bf16.msra.mxu1 %v4732_v31  ;;  %2993 = vmatprep.subr.bf16.mxu0 %v4737_v32  ;;  %v4867_v31 = vld [vmem:[#allocation14 + $0x40] sm:$0xff]  }
 0x434   :  { %3157 = vmatprep.subr.bf16.mxu1 %v4740_v36  ;;  %v4868_v32 = vld [vmem:[#allocation14] sm:$0xff]   ;;  %v4869_v36 = vld [vmem:[#allocation14 + $0x48] sm:$0xff]  }
 0x436   :  { %2994 = vmatpush1.bf16.msra.mxu0 %v4735_v39  ;;  %v4870_v39 = vld [vmem:[#allocation14 + $0x8] sm:$0xff]  }
 0x437   :  { %3158 = vmatpush1.bf16.msra.mxu1 %v4738_v46  ;;  %2995 = vmatprep.subr.bf16.mxu0 %v4743_v48  ;;  %v4871_v46 = vld [vmem:[#allocation14 + $0x50] sm:$0xff]  }
 0x438   :  { %3159 = vmatprep.subr.bf16.mxu1 %v4746_v27  ;;  %v4872_v48 = vld [vmem:[#allocation14 + $0x10] sm:$0xff]   ;;  %v4873_v27 = vld [vmem:[#allocation14 + $0x58] sm:$0xff]  }
 0x43a   :  { %2996 = vmatpush1.bf16.msra.mxu0 %v4741_v53  ;;  %v4874_v53 = vld [vmem:[#allocation14 + $0x18] sm:$0xff]  }
 0x43b   :  { %3160 = vmatpush1.bf16.msra.mxu1 %v4744_v54  ;;  %2997 = vmatprep.subr.bf16.mxu0 %v4749_v57  ;;  %v4875_v54 = vld [vmem:[#allocation14 + $0x60] sm:$0xff]  }
 0x43c   :  { %3161 = vmatprep.subr.bf16.mxu1 %v4752_v58  ;;  %v4876_v57 = vld [vmem:[#allocation14 + $0x20] sm:$0xff]   ;;  %v4877_v58 = vld [vmem:[#allocation14 + $0x68] sm:$0xff]  }
 0x43e   :  { %2998 = vmatpush1.bf16.msra.mxu0 %v4747_v59  ;;  %v4878_v59 = vld [vmem:[#allocation14 + $0x28] sm:$0xff]  }
 0x43f   :  { %3162 = vmatpush1.bf16.msra.mxu1 %v4750_v61  ;;  %2999 = vmatprep.subr.bf16.mxu0 %v4755_v62  ;;  %v5431_v61 = vld [vmem:[%s5474_s8] sm:$0xf] }
 0x440   :  { %3163 = vmatprep.subr.bf16.mxu1 %v4758_v0  ;;  %v1553_v62 = vrot.slane %v5431_v61, %v5299_v47  ;;  %v1557_v0 = vrot.slane %v5431_v61, %v5308_v44 }
 0x442   :  { %3000 = vmatpush1.bf16.msra.mxu0 %v4753_v1  ;;  %v1565_v1 = vrot.slane %v5431_v61, %v410_v29 }
 0x443   :  { %3164 = vmatpush1.bf16.msra.mxu1 %v4756_v15  ;;  %3001 = vmatprep.subr.bf16.mxu0 %v4761_v7 }
 0x444   :  { %3165 = vmatprep.subr.bf16.mxu1 %v4764_v26 }
 0x446   :  { %3002 = vmatpush1.bf16.msra.mxu0 %v4759_v9 }
 0x447   :  { %3166 = vmatpush1.bf16.msra.mxu1 %v4762_v3  ;;  %3003 = vmatprep.subr.bf16.mxu0 %v4767_v38 }
 0x448   :  { %3167 = vmatprep.subr.bf16.mxu1 %v4770_v4 }
 0x44a   :  { %3004 = vmatpush1.bf16.msra.mxu0 %v4765_v5 }
 0x44b   :  { %3168 = vmatpush1.bf16.msra.mxu1 %v4768_v50  ;;  %3582 = vmatprep.subr.bf16.mxu0 %v4773_v43 }
 0x44c   :  { %4284 = vmatprep.subr.bf16.mxu1 %v4867_v31  ;;  %v1561_v31 = vrot.slane %v5431_v61, %v406_v25  ;;  %v4882_v25 = vld [vmem:[#allocation14 + $0x38] sm:$0xff]  }
 0x44d   :  { %3006 = vmatmul.mubr.bf16.vlgmr.msra.gmra.mrb[8].mxu0 %v1290_v8 }
 0x44e   :  { %3170 = vmatmul.mubr.bf16.vlgmr.msra.gmra.mrb[32].mxu1 %v1290_v8  ;;  %3583 = vmatpush1.bf16.msra.mxu0 %v4771_v52 }
 0x44f   :  { %3584 = vmatprep.subr.bf16.mxu0 %v4776_v49  ;;  %4285 = vmatpush3.bf16.msra.mxu1 %v4868_v32  ;;  %v4863_v32 = vld [vmem:[#allocation12 + $0x1e4] ss:$8 sps:$4 sm:$0xff]  }
 0x450   :  { %4286 = vmatprep.subr.bf16.mxu1 %v4869_v36  ;;  %v4861_v36 = vld [vmem:[#allocation12 + $0x1e0] ss:$8 sps:$4 sm:$0xff]  }
 0x452   :  { %3585 = vmatpush1.bf16.msra.mxu0 %v4774_v33 }
 0x453   :  { %3586 = vmatprep.subr.bf16.mxu0 %v4779_v11  ;;  %4287 = vmatpush3.bf16.msra.mxu1 %v4870_v39 }
 0x454   :  { %4288 = vmatprep.subr.bf16.mxu1 %v4871_v46  ;;  %v4866_v46 = vld [vmem:[#allocation12 + $0x1f4] ss:$8 sps:$4 sm:$0xff]  }
 0x456   :  { %3587 = vmatpush1.bf16.msra.mxu0 %v4777_v12  ;;  %v4819_v12 = vld [vmem:[#allocation12 + $0x100] ss:$8 sps:$4 sm:$0xff]  }
 0x457   :  { %3588 = vmatprep.subr.bf16.mxu0 %v4782_v13  ;;  %4289 = vmatpush3.bf16.msra.mxu1 %v4872_v48  ;;  %v4864_v48 = vld [vmem:[#allocation12 + $0x1f0] ss:$8 sps:$4 sm:$0xff]  }
 0x458   :  { %4290 = vmatprep.subr.bf16.mxu1 %v4873_v27 }
 0x45a   :  { %3589 = vmatpush1.bf16.msra.mxu0 %v4780_v34  ;;  %v4824_v34 = vld [vmem:[#allocation12 + $0x114] ss:$8 sps:$4 sm:$0xff]  }
 0x45b   :  { %3590 = vmatprep.subr.bf16.mxu0 %v4785_v37  ;;  %4291 = vmatpush3.bf16.msra.mxu1 %v4874_v53  ;;  %v4822_v37 = vld [vmem:[#allocation12 + $0x110] ss:$8 sps:$4 sm:$0xff]  }
 0x45c   :  { %4292 = vmatprep.subr.bf16.mxu1 %v4875_v54  ;;  %v4879_v54 = vld [vmem:[#allocation14 + $0x70] sm:$0xff]  }
 0x45e   :  { %3591 = vmatpush1.bf16.msra.mxu0 %v4783_v40  ;;  %v4827_v40 = vld [vmem:[#allocation12 + $0x124] ss:$8 sps:$4 sm:$0xff]  }
 0x45f   :  { %3592 = vmatprep.subr.bf16.mxu0 %v4788_v63  ;;  %4293 = vmatpush3.bf16.msra.mxu1 %v4876_v57  ;;  %v4825_v63 = vld [vmem:[#allocation12 + $0x120] ss:$8 sps:$4 sm:$0xff]   ;;  %v4880_v57 = vld [vmem:[#allocation14 + $0x30] sm:$0xff]  }
 0x460   :  { %4294 = vmatprep.subr.bf16.mxu1 %v4877_v58  ;;  %v3250_v58 = vld [vmem:[%s5476_s10] sm:$0x3]  ;;  %s5088_s10 = smov [#allocation15]  }
 0x461   :  { %v3259_v61 = vrot.slane %v3250_v58, %v5308_v44  ;;  %s3850_s1 = sshll.u32 %s5088_s10, 4  ;;  %s3851_s1 = int_to_ptr.vmem [resolvable:$true] %s3850_s1 }
 0x462   :  { %3593 = vmatpush1.bf16.msra.mxu0 %v4786_v14  ;;  %v4830_v14 = vld [vmem:[#allocation12 + $0x134] ss:$8 sps:$4 sm:$0xff]   ;;  %s5037_s2 = scalar_lea.vmem %s3851_s1, 32  ;;  %p5042_p1 = scmp.lt.s32.totalorder %s3851_s1, %s3851_s1 }
 0x463   :  { %3594 = vmatprep.subr.bf16.mxu0 %v4791_v51  ;;  %4295 = vmatpush3.bf16.msra.mxu1 %v4878_v59  ;;  %v4828_v51 = vld [vmem:[#allocation12 + $0x130] ss:$8 sps:$4 sm:$0xff]   ;;  %v3255_v59 = vrot.slane %v3250_v58, %v5299_v47  ;;  %p5038_p0 = scmp.ne.s32.totalorder %s3851_s1, %s5037_s2  ;;  %p5043_p2 = scmp.lt.s32.totalorder %s5037_s2, %s5037_s2 }
 0x464   :  { %4296 = vmatprep.subr.bf16.mxu1 %v4879_v54 }
 0x465   :  { %p5044_p3 = por %p5043_p2, %p5042_p1 }
 0x466   :  { %3595 = vmatpush1.bf16.msra.mxu0 %v4789_v10  ;;  %v4833_v10 = vld [vmem:[#allocation12 + $0x144] ss:$8 sps:$4 sm:$0xff]  }
 0x467   :  { %3596 = vmatprep.subr.bf16.mxu0 %v4794_v16  ;;  %v4831_v16 = vld [vmem:[#allocation12 + $0x140] ss:$8 sps:$4 sm:$0xff]   ;;  %4297 = vmatpush3.bf16.msra.mxu1 %v4880_v57  ;;  %p5045_p4 = pnand %p5044_p3, %p5038_p0 }
 0x468   :  { %4298 = vmatprep.subr.bf16.mxu1 %v4881_v42 }
 0x46a   :  { %3597 = vmatpush1.bf16.msra.mxu0 %v4792_v17  ;;  %v4836_v17 = vld [vmem:[#allocation12 + $0x154] ss:$8 sps:$4 sm:$0xff]  }
 0x46b   :  { %3598 = vmatprep.subr.bf16.mxu0 %v4797_v55  ;;  %v4834_v55 = vld [vmem:[#allocation12 + $0x150] ss:$8 sps:$4 sm:$0xff]   ;;  %4299 = vmatpush3.bf16.msra.mxu1 %v4882_v25 }
 0x46e   :  { %3599 = vmatpush1.bf16.msra.mxu0 %v4795_v56  ;;  %v4839_v56 = vld [vmem:[#allocation12 + $0x164] ss:$8 sps:$4 sm:$0xff]  }
 0x46f   :  { %3600 = vmatprep.subr.bf16.mxu0 %v4800_v60  ;;  %v4837_v60 = vld [vmem:[#allocation12 + $0x160] ss:$8 sps:$4 sm:$0xff]  }
 0x472   :  { %3601 = vmatpush1.bf16.msra.mxu0 %v4798_v18  ;;  %v4842_v18 = vld [vmem:[#allocation12 + $0x174] ss:$8 sps:$4 sm:$0xff]  }
 0x473   :  { %3602 = vmatprep.subr.bf16.mxu0 %v4803_v19  ;;  %v4840_v19 = vld [vmem:[#allocation12 + $0x170] ss:$8 sps:$4 sm:$0xff]  }
 0x476   :  { %3603 = vmatpush1.bf16.msra.mxu0 %v4801_v20  ;;  %v4845_v20 = vld [vmem:[#allocation12 + $0x184] ss:$8 sps:$4 sm:$0xff]  }
 0x477   :  { %3604 = vmatprep.subr.bf16.mxu0 %v4806_v21  ;;  %v4843_v21 = vld [vmem:[#allocation12 + $0x180] ss:$8 sps:$4 sm:$0xff]  }
 0x47a   :  { %3605 = vmatpush1.bf16.msra.mxu0 %v4804_v35  ;;  %v4848_v35 = vld [vmem:[#allocation12 + $0x194] ss:$8 sps:$4 sm:$0xff]  }
 0x47b   :  { %3606 = vmatprep.subr.bf16.mxu0 %v4809_v41  ;;  %v4846_v41 = vld [vmem:[#allocation12 + $0x190] ss:$8 sps:$4 sm:$0xff]  }
 0x47e   :  { %3607 = vmatpush1.bf16.msra.mxu0 %v4807_v22  ;;  %v4851_v22 = vld [vmem:[#allocation12 + $0x1a4] ss:$8 sps:$4 sm:$0xff]  }
 0x47f   :  { %3608 = vmatprep.subr.bf16.mxu0 %v4812_v23  ;;  %v4849_v23 = vld [vmem:[#allocation12 + $0x1a0] ss:$8 sps:$4 sm:$0xff]  }
 0x482   :  { %3609 = vmatpush1.bf16.msra.mxu0 %v4810_v24  ;;  %v4854_v24 = vld [vmem:[#allocation12 + $0x1b4] ss:$8 sps:$4 sm:$0xff]  }
 0x483   :  { %3610 = vmatprep.subr.bf16.mxu0 %v4815_v2  ;;  %v4852_v2 = vld [vmem:[#allocation12 + $0x1b0] ss:$8 sps:$4 sm:$0xff]  }
 0x486   :  { %3611 = vmatpush1.bf16.msra.mxu0 %v4813_v45  ;;  %v4857_v45 = vld [vmem:[#allocation12 + $0x1c4] ss:$8 sps:$4 sm:$0xff]  }
 0x487   :  { %3612 = vmatprep.subr.bf16.mxu0 %v4818_v6  ;;  %v4855_v6 = vld [vmem:[#allocation12 + $0x1c0] ss:$8 sps:$4 sm:$0xff]  }
 0x48a   :  { %3613 = vmatpush1.bf16.msra.mxu0 %v4816_v28  ;;  %v4860_v28 = vld [vmem:[#allocation12 + $0x1d4] ss:$8 sps:$4 sm:$0xff]  }
 0x48b   :  { %3623 = vmatprep.subr.bf16.mxu0 %v4821_v30  ;;  %v4858_v30 = vld [vmem:[#allocation12 + $0x1d0] ss:$8 sps:$4 sm:$0xff]  }
 0x520   :  { %v3007_v15 = vpop.f32.mrb[8].mxu0 }
 0x521   :  { %v4324_v7 = vadd.f32 %v3007_v15, %v1553_v62  ;;  %v5440_v26 = vpop.f32.mrb[32].mxu1  ;;  %v3009_v9 = vpop.f32.mrb[9].mxu0 }
 0x522   :  { %v4325_v3 = vadd.f32 %v3009_v9, %v1557_v0  ;;  %v3173_v38 = vpop.f32.mrb[33].mxu1  ;;  %v3011_v4 = vpop.f32.mrb[10].mxu0  ;;  %v4326_v39 = vadd.f32 %v5440_v26, %v1561_v31 }
 0x523   :  { %v3178_v5 = vmax.f32 %v4324_v7, 0.0  ;;  %v4327_v50 = vadd.f32 %v3173_v38, %v1565_v1  ;;  %v3175_v43 = vpop.f32.mrb[34].mxu1  ;;  %v3012_v52 = vpop.f32.mrb[11].mxu0 }
 0x524   :  { %v3179_v8 = vmax.f32 %v4325_v3, 0.0  ;;  %v3176_v49 = vpop.f32.mrb[35].mxu1  ;;  %v3180_v27 = vmax.f32 %v4326_v39, 0.0 }
 0x525   :  { %v3181_v33 = vmax.f32 %v4327_v50, 0.0  ;;  %v3182_v13 = vpack.c.bf16 %v3178_v5, %v3178_v5  ;;  %v4258_v50 = vld [vmem:[%s5478_s12] ss:$0 sm:$0xff] }
 0x526   :  { %v3183_v11 = vpack.c.bf16 %v3179_v8, %v3179_v8  ;;  %v3184_v53 = vpack.c.bf16 %v3180_v27, %v3180_v27 }
 0x527   :  { %v3185_v29 = vpack.c.bf16 %v3181_v33, %v3181_v33 }
 0x528   :  { %3614 = vmatprep.mubr.bf16.mxu0 %v3183_v11 }
 0x529   :  { %3615 = vmatmul.mubr.bf16.vlgmr.msra.gmra.mrb[12].mxu0 %v3182_v13 }
 0x52a   :  { %3624 = vmatpush1.bf16.msra.mxu0 %v4819_v12  ;;  %3655 = vmatprep.mubr.bf16.mxu0 %v3185_v29 }
 0x52b   :  { %3625 = vmatprep.subr.bf16.mxu0 %v4824_v34 }
 0x52e   :  { %3626 = vmatpush1.bf16.msra.mxu0 %v4822_v37 }
 0x52f   :  { %3627 = vmatprep.subr.bf16.mxu0 %v4827_v40 }
 0x532   :  { %3628 = vmatpush1.bf16.msra.mxu0 %v4825_v63 }
 0x533   :  { %3629 = vmatprep.subr.bf16.mxu0 %v4830_v14 }
 0x536   :  { %3630 = vmatpush1.bf16.msra.mxu0 %v4828_v51 }
 0x537   :  { %3631 = vmatprep.subr.bf16.mxu0 %v4833_v10 }
 0x53a   :  { %3632 = vmatpush1.bf16.msra.mxu0 %v4831_v16 }
 0x53b   :  { %3633 = vmatprep.subr.bf16.mxu0 %v4836_v17 }
 0x53e   :  { %3634 = vmatpush1.bf16.msra.mxu0 %v4834_v55 }
 0x53f   :  { %3635 = vmatprep.subr.bf16.mxu0 %v4839_v56 }
 0x542   :  { %3636 = vmatpush1.bf16.msra.mxu0 %v4837_v60 }
 0x543   :  { %3637 = vmatprep.subr.bf16.mxu0 %v4842_v18 }
 0x546   :  { %3638 = vmatpush1.bf16.msra.mxu0 %v4840_v19 }
 0x547   :  { %3639 = vmatprep.subr.bf16.mxu0 %v4845_v20 }
 0x54a   :  { %3640 = vmatpush1.bf16.msra.mxu0 %v4843_v21 }
 0x54b   :  { %3641 = vmatprep.subr.bf16.mxu0 %v4848_v35 }
 0x54e   :  { %3642 = vmatpush1.bf16.msra.mxu0 %v4846_v41 }
 0x54f   :  { %3643 = vmatprep.subr.bf16.mxu0 %v4851_v22 }
 0x552   :  { %3644 = vmatpush1.bf16.msra.mxu0 %v4849_v23 }
 0x553   :  { %3645 = vmatprep.subr.bf16.mxu0 %v4854_v24 }
 0x556   :  { %3646 = vmatpush1.bf16.msra.mxu0 %v4852_v2 }
 0x557   :  { %3647 = vmatprep.subr.bf16.mxu0 %v4857_v45 }
 0x55a   :  { %3648 = vmatpush1.bf16.msra.mxu0 %v4855_v6 }
 0x55b   :  { %3649 = vmatprep.subr.bf16.mxu0 %v4860_v28 }
 0x55e   :  { %3650 = vmatpush1.bf16.msra.mxu0 %v4858_v30 }
 0x55f   :  { %3651 = vmatprep.subr.bf16.mxu0 %v4863_v32 }
 0x562   :  { %3652 = vmatpush1.bf16.msra.mxu0 %v4861_v36 }
 0x563   :  { %3653 = vmatprep.subr.bf16.mxu0 %v4866_v46 }
 0x566   :  { %3654 = vmatpush1.bf16.msra.mxu0 %v4864_v48 }
 0x569   :  { %3656 = vmatmul.mubr.bf16.vlgmr.msra.gmra.mrb[12].mxu0 %v3184_v53 }
 0x63c   :  { %v3657_v62 = vpop.f32.mrb[12].mxu0 }
 0x63d   :  { %v4328_v0 = vadd.f32 %v3657_v62, %v3255_v59  ;;  %v3659_v1 = vpop.f32.mrb[13].mxu0 }
 0x63e   :  { %v4329_v15 = vadd.f32 %v3659_v1, %v3259_v61  ;;  %v3661_v7 = vpop.f32.mrb[14].mxu0 }
 0x63f   :  { %v3664_v26 = vmax.f32 %v4328_v0, 0.0  ;;  %v3662_v9 = vpop.f32.mrb[15].mxu0 }
 0x640   :  { %v3665_v3 = vmax.f32 %v4329_v15, 0.0 }
 0x641   :  { %v3666_v4 = vpack.c.bf16 %v3664_v26, %v3664_v26 }
 0x642   :  { %v3667_v38 = vpack.c.bf16 %v3665_v3, %v3665_v3 }
 0x644   :  { %3835 = vmatprep.mubr.bf16.mxu1 %v3667_v38 }
 0x645   :  { %3836 = vmatmul.mubr.bf16.vlgmr.msra.gmra.mrb[36].mxu1 %v3666_v4 }
 0x718   :  { %v4300_v5 = vpop.f32.mrb[36].mxu1 }
 0x719   :  { %v4301_v47 = vpop.f32.mrb[37].mxu1 }
 0x71a   :  { %v4302_v44 = vadd.f32 %v4301_v47, %v4300_v5  ;;  %v4303_v43 = vpop.f32.mrb[38].mxu1 }
 0x71b   :  { %v4304_v52 = vpop.f32.mrb[39].mxu1 }
 0x71c   :  { %v3838_v8 = vadd.f32 %v4302_v44, %v4258_v50 }
 0x71e   :  { %3843 = vst [vmem:[#allocation15] sm:$0x3] %v3838_v8 }
 0x71f   :  { %5048 = shalt.err (!%p5045_p4)
}
 0x720   :  { %s5049_s12 = scalar_lea.hbm %s5479_s13, 32 }
 0x721   :  { %p5050_p5 = scmp.ne.s32.totalorder %s5479_s13, %s5049_s12  ;;  %p5053_p6 = scmp.lt.u32.totalorder %s5049_s12, %s5479_s13 }
 0x723   :  { %p5055_p7 = pnand %p5053_p6, %p5050_p5 }
 0x725   :  { %5058 = shalt.err (!%p5055_p7)
}
 0x726   :  { %3853 = dma.vmem_to_hbm [thread:$0]  %s3851_s1, 32, %s5479_s13, [#allocation5]  }
 0x727   :  { %5067 = dma.done.wait [#allocation5], 32  }
 0x728   :  { %5068 = vsyncadd [#allocation5], 4294967264 }
 0x729   :  { %3857 = vsyncpa [#allocation4], 1 }
 0x72a   :  { %3858 = vsyncpa [#allocation7], 1 }
 0x72b   :  { %3859 = vsyncpa [#allocation10], 1 }
 0x72c   :  { %3860 = vsyncpa [#allocation13], 1 }
 0x72d   :  { %3861 = vsyncpa [#allocation5], 1 }

</bundles_post_ra>
